<compile_context>
chip_gen: v7x
topology: tpu7x:2x2x1
jax: 0.10.0
libtpu: 0.0.40
codegen_flags: <defaults>
</compile_context>

<pallas_src>
import jax
import jax.numpy as jnp
from jax.experimental import pallas as pl
from jax.experimental.pallas import tpu as pltpu

# ----------------------------- configuration --------------------------------
BATCH = 2
INPUT_DIM = 4
SEQ_LEN = 8
HIDDEN = 32
PRED_LEN = 8
NUM_LAYERS = 3                          # => NUM_LAYERS - 1 = 2 FAN layers
NUM_FAN_LAYERS = NUM_LAYERS - 1
P_DIM = int(HIDDEN * 0.25)              # 8
G_DIM = HIDDEN - 2 * P_DIM              # 16

_SQRT1_2 = 0.7071067811865476


def _gelu(x):
    # exact GELU (matches nn.GELU() default, erf based)
    return 0.5 * x * (1.0 + jax.lax.erf(x * _SQRT1_2))


# ------------------------- parameter slab layout -----------------------------
# One lane-dense (SLAB_ROWS, HIDDEN) f32 slab holds every parameter; big blocks
# are aligned to 8-sublane boundaries.  Offsets are static Python ints.
def _align8(n):
    return ((n + 7) // 8) * 8


_off = 0
EMB_W_OFF = _off; _off += INPUT_DIM          # (INPUT_DIM, H)
EMB_B_OFF = _off; _off += 1                  # (1, H)
_off = _align8(_off)
POS_OFF = _off; _off += SEQ_LEN              # (SEQ_LEN, H)
_off = _align8(_off)
FAN_W_OFFS = []
FAN_B_OFFS = []
for _ in range(NUM_FAN_LAYERS):
    FAN_W_OFFS.append(_off); _off += HIDDEN  # fused (H, H)
    FAN_B_OFFS.append(_off); _off += 1       # fused (1, H)
    _off = _align8(_off)
PROJ_W_OFF = _off; _off += SEQ_LEN * HIDDEN  # (S*H, H)
PROJ_B_OFF = _off; _off += 1                 # (1, H)
_off = _align8(_off)
OUT_W_OFF = _off; _off += HIDDEN             # (H, H), lanes >= PRED_LEN are zero
OUT_B_OFF = _off; _off += 1                  # (1, H), lanes >= PRED_LEN are zero
SLAB_ROWS = _align8(_off)                    # = 400 for these shapes


# ------------------------------ Pallas kernel --------------------------------
def fan_forecaster_kernel(x_ref, w_ref, o_ref):
    """Fully fused forward pass.

    x_ref : (B, SEQ_LEN*INPUT_DIM)  raw input
    w_ref : (SLAB_ROWS, HIDDEN)     packed parameter slab
    o_ref : (B, PRED_LEN)           output
    Everything is resident in VMEM; single grid point (toy shapes).
    """
    b = x_ref.shape[0]
    x = x_ref[...]                                          # (B, S*IN)

    emb_w = w_ref[pl.ds(EMB_W_OFF, INPUT_DIM), :]           # (IN, H)
    emb_b = w_ref[pl.ds(EMB_B_OFF, 1), :]                   # (1, H)

    # --- embedding + positional encoding, built per time step ---------------
    # token rows are step-major: row s*b + i  <->  (batch=i, step=s)
    rows = []
    for s in range(SEQ_LEN):
        xs = x[:, s * INPUT_DIM:(s + 1) * INPUT_DIM]        # (B, IN) lane slice
        pos_s = w_ref[pl.ds(POS_OFF + s, 1), :]             # (1, H)
        rows.append(jnp.dot(xs, emb_w, preferred_element_type=jnp.float32)
                    + emb_b + pos_s)                        # (B, H)
    h = jnp.concatenate(rows, axis=0)                       # (S*B, H)

    # --- FAN layers: one fused HxH matmul + lane-masked cos/sin/GELU --------
    lane = jax.lax.broadcasted_iota(jnp.int32, h.shape, 1)
    for w_off, b_off in zip(FAN_W_OFFS, FAN_B_OFFS):
        z = jnp.dot(h, w_ref[pl.ds(w_off, HIDDEN), :],
                    preferred_element_type=jnp.float32)
        z = z + w_ref[pl.ds(b_off, 1), :]
        h = jnp.where(lane < P_DIM, jnp.cos(z),
                      jnp.where(lane < 2 * P_DIM, jnp.sin(z), _gelu(z)))

    # --- head: ReLU(Linear(S*H -> H)) as a contraction over (S, H) ----------
    acc = jnp.zeros((b, HIDDEN), jnp.float32)
    for s in range(SEQ_LEN):
        pw_s = w_ref[pl.ds(PROJ_W_OFF + s * HIDDEN, HIDDEN), :]    # (H, H)
        acc = acc + jnp.dot(h[s * b:(s + 1) * b, :], pw_s,
                            preferred_element_type=jnp.float32)
    z = jnp.maximum(acc + w_ref[pl.ds(PROJ_B_OFF, 1), :], 0.0)     # (B, H)

    # --- output layer (weights zero-padded to H lanes inside the slab) ------
    out = jnp.dot(z, w_ref[pl.ds(OUT_W_OFF, HIDDEN), :],
                  preferred_element_type=jnp.float32)
    out = out + w_ref[pl.ds(OUT_B_OFF, 1), :]                      # (B, H)
    o_ref[...] = out[:, :PRED_LEN]


_VMEM_SPEC = pl.BlockSpec(memory_space=pltpu.MemorySpace.VMEM)


# ------------------------------ parameter init -------------------------------
def _linear_params(key, in_dim, out_dim):
    """PyTorch nn.Linear is x @ W.T + b; store W pre-transposed as (in, out)."""
    kw, kb = jax.random.split(key)
    scale = (2.0 / (in_dim + out_dim)) ** 0.5
    w = scale * jax.random.normal(kw, (in_dim, out_dim), jnp.float32)
    b = 0.01 * jax.random.normal(kb, (1, out_dim), jnp.float32)
    return w, b


def _build_param_slab(p):
    slab = jnp.zeros((SLAB_ROWS, HIDDEN), jnp.float32)
    slab = slab.at[EMB_W_OFF:EMB_W_OFF + INPUT_DIM].set(p["emb_w"])
    slab = slab.at[EMB_B_OFF].set(p["emb_b"][0])
    slab = slab.at[POS_OFF:POS_OFF + SEQ_LEN].set(p["pos"])
    for li in range(NUM_FAN_LAYERS):
        i = li + 1
        # fused FAN weight: columns [0,P)=p_w (cos), [P,2P)=p_w (sin), [2P,H)=g_w
        w_f = jnp.concatenate([p[f"p_w{i}"], p[f"p_w{i}"], p[f"g_w{i}"]], axis=1)
        b_f = jnp.concatenate([p[f"p_b{i}"], p[f"p_b{i}"], p[f"g_b{i}"]], axis=1)
        slab = slab.at[FAN_W_OFFS[li]:FAN_W_OFFS[li] + HIDDEN].set(w_f)
        slab = slab.at[FAN_B_OFFS[li]].set(b_f[0])
    slab = slab.at[PROJ_W_OFF:PROJ_W_OFF + SEQ_LEN * HIDDEN].set(p["proj_w"])
    slab = slab.at[PROJ_B_OFF].set(p["proj_b"][0])
    out_w_pad = jnp.zeros((HIDDEN, HIDDEN), jnp.float32).at[:, :PRED_LEN].set(p["out_w"])
    out_b_pad = jnp.zeros((HIDDEN,), jnp.float32).at[:PRED_LEN].set(p["out_b"][0])
    slab = slab.at[OUT_W_OFF:OUT_W_OFF + HIDDEN].set(out_w_pad)
    slab = slab.at[OUT_B_OFF].set(out_b_pad)
    return slab


def init_params(key):
    keys = jax.random.split(key, 8)
    params = {}
    params["emb_w"], params["emb_b"] = _linear_params(keys[0], INPUT_DIM, HIDDEN)
    # xavier_uniform on (1, seq_len, hidden); stored as (seq_len, hidden)
    pos_scale = (6.0 / (SEQ_LEN + HIDDEN)) ** 0.5
    params["pos"] = jax.random.uniform(
        keys[1], (SEQ_LEN, HIDDEN), jnp.float32, -pos_scale, pos_scale)
    params["p_w1"], params["p_b1"] = _linear_params(keys[2], HIDDEN, P_DIM)
    params["g_w1"], params["g_b1"] = _linear_params(keys[3], HIDDEN, G_DIM)
    params["p_w2"], params["p_b2"] = _linear_params(keys[4], HIDDEN, P_DIM)
    params["g_w2"], params["g_b2"] = _linear_params(keys[5], HIDDEN, G_DIM)
    params["proj_w"], params["proj_b"] = _linear_params(
        keys[6], SEQ_LEN * HIDDEN, HIDDEN)
    params["out_w"], params["out_b"] = _linear_params(keys[7], HIDDEN, PRED_LEN)
    # pack everything into one lane-aligned slab (built once, off the hot path)
    params["slab"] = _build_param_slab(params)
    return params


# ------------------------------ forward wrapper ------------------------------
@jax.jit
def fan_forecaster_forward(x, param_slab):
    b = x.shape[0]
    expected = SEQ_LEN * INPUT_DIM
    actual = x.shape[1]
    # static (shape-known) pad / truncate, mirroring the PyTorch branch
    if actual != expected:
        if actual > expected:
            x = x[:, :expected]
        else:
            x = jnp.concatenate(
                [x, jnp.zeros((b, expected - actual), x.dtype)], axis=1)

    return pl.pallas_call(
        fan_forecaster_kernel,
        out_shape=jax.ShapeDtypeStruct((b, PRED_LEN), jnp.float32),
        in_specs=[_VMEM_SPEC, _VMEM_SPEC],
        out_specs=_VMEM_SPEC,
    )(x, param_slab)


# ------------------------------ pure-JAX reference ---------------------------
def _reference(x, params):
    b = x.shape[0]
    h = x.reshape(b * SEQ_LEN, INPUT_DIM) @ params["emb_w"] + params["emb_b"]
    h = h.reshape(b, SEQ_LEN, HIDDEN) + params["pos"][None]
    h = h.reshape(b * SEQ_LEN, HIDDEN)
    for i in range(1, NUM_LAYERS):
        p = h @ params[f"p_w{i}"] + params[f"p_b{i}"]
        g = _gelu(h @ params[f"g_w{i}"] + params[f"g_b{i}"])
        h = jnp.concatenate([jnp.cos(p), jnp.sin(p), g], axis=-1)
    h = h.reshape(b, SEQ_LEN * HIDDEN)
    z = jnp.maximum(h @ params["proj_w"] + params["proj_b"], 0.0)
    return z @ params["out_w"] + params["out_b"]


# ----------------------------------- main ------------------------------------
if __name__ == "__main__":
    x = jax.random.normal(jax.random.PRNGKey(0),
                          (BATCH, SEQ_LEN * INPUT_DIM), jnp.float32)
    params = init_params(jax.random.PRNGKey(42))

    out = fan_forecaster_forward(x, params["slab"])
    out = jax.block_until_ready(out)

    ref = _reference(x, params)
    assert out.shape == (BATCH, PRED_LEN)
    assert jnp.allclose(out, ref, atol=1e-4, rtol=1e-4)

    print("KERNEL_OK")
</pallas_src>

<mosaic_0001>
module attributes {stable_mosaic.version = 11 : i64} {
  func.func @fan_forecaster_kernel(%arg0: memref<2x32xf32, #tpu.memory_space<vmem>>, %arg1: memref<400x32xf32, #tpu.memory_space<vmem>>, %arg2: memref<2x8xf32, #tpu.memory_space<vmem>>) attributes {dimension_semantics = [], scalar_prefetch = 0 : i64, scratch_operands = 0 : i64, tpu.core_type = #tpu.core_type<tc>} {
    %c0 = arith.constant 0 : index
    %c0_0 = arith.constant 0 : index
    %0 = vector.load %arg0[%c0, %c0_0] : memref<2x32xf32, #tpu.memory_space<vmem>>, vector<2x32xf32>
    %c0_1 = arith.constant 0 : index
    %c0_2 = arith.constant 0 : index
    %1 = vector.load %arg1[%c0_1, %c0_2] : memref<400x32xf32, #tpu.memory_space<vmem>>, vector<4x32xf32>
    %c4 = arith.constant 4 : index
    %c0_3 = arith.constant 0 : index
    %2 = vector.load %arg1[%c4, %c0_3] : memref<400x32xf32, #tpu.memory_space<vmem>>, vector<1x32xf32>
    %3 = vector.extract_strided_slice %0 {offsets = [0, 0], sizes = [2, 4], strides = [1, 1]} : vector<2x32xf32> to vector<2x4xf32>
    %c8 = arith.constant 8 : index
    %c0_4 = arith.constant 0 : index
    %4 = vector.load %arg1[%c8, %c0_4] : memref<400x32xf32, #tpu.memory_space<vmem>>, vector<1x32xf32>
    %cst = arith.constant dense<0.000000e+00> : vector<2x32xf32>
    %5 = tpu.matmul %3, %1, %cst {dimension_numbers = #tpu.dot_dimension_numbers<[1], [0], [0], [1], [0, 0, 1, 1], [], []>} : vector<2x4xf32>, vector<4x32xf32>, vector<2x32xf32> -> vector<2x32xf32>
    %6 = vector.broadcast %2 : vector<1x32xf32> to vector<2x32xf32>
    %7 = arith.addf %5, %6 : vector<2x32xf32>
    %8 = vector.broadcast %4 : vector<1x32xf32> to vector<2x32xf32>
    %9 = arith.addf %7, %8 : vector<2x32xf32>
    %10 = vector.extract_strided_slice %0 {offsets = [0, 4], sizes = [2, 4], strides = [1, 1]} : vector<2x32xf32> to vector<2x4xf32>
    %c9 = arith.constant 9 : index
    %c0_5 = arith.constant 0 : index
    %11 = vector.load %arg1[%c9, %c0_5] : memref<400x32xf32, #tpu.memory_space<vmem>>, vector<1x32xf32>
    %cst_6 = arith.constant dense<0.000000e+00> : vector<2x32xf32>
    %12 = tpu.matmul %10, %1, %cst_6 {dimension_numbers = #tpu.dot_dimension_numbers<[1], [0], [0], [1], [0, 0, 1, 1], [], []>} : vector<2x4xf32>, vector<4x32xf32>, vector<2x32xf32> -> vector<2x32xf32>
    %13 = vector.broadcast %2 : vector<1x32xf32> to vector<2x32xf32>
    %14 = arith.addf %12, %13 : vector<2x32xf32>
    %15 = vector.broadcast %11 : vector<1x32xf32> to vector<2x32xf32>
    %16 = arith.addf %14, %15 : vector<2x32xf32>
    %17 = vector.extract_strided_slice %0 {offsets = [0, 8], sizes = [2, 4], strides = [1, 1]} : vector<2x32xf32> to vector<2x4xf32>
    %c10 = arith.constant 10 : index
    %c0_7 = arith.constant 0 : index
    %18 = vector.load %arg1[%c10, %c0_7] : memref<400x32xf32, #tpu.memory_space<vmem>>, vector<1x32xf32>
    %cst_8 = arith.constant dense<0.000000e+00> : vector<2x32xf32>
    %19 = tpu.matmul %17, %1, %cst_8 {dimension_numbers = #tpu.dot_dimension_numbers<[1], [0], [0], [1], [0, 0, 1, 1], [], []>} : vector<2x4xf32>, vector<4x32xf32>, vector<2x32xf32> -> vector<2x32xf32>
    %20 = vector.broadcast %2 : vector<1x32xf32> to vector<2x32xf32>
    %21 = arith.addf %19, %20 : vector<2x32xf32>
    %22 = vector.broadcast %18 : vector<1x32xf32> to vector<2x32xf32>
    %23 = arith.addf %21, %22 : vector<2x32xf32>
    %24 = vector.extract_strided_slice %0 {offsets = [0, 12], sizes = [2, 4], strides = [1, 1]} : vector<2x32xf32> to vector<2x4xf32>
    %c11 = arith.constant 11 : index
    %c0_9 = arith.constant 0 : index
    %25 = vector.load %arg1[%c11, %c0_9] : memref<400x32xf32, #tpu.memory_space<vmem>>, vector<1x32xf32>
    %cst_10 = arith.constant dense<0.000000e+00> : vector<2x32xf32>
    %26 = tpu.matmul %24, %1, %cst_10 {dimension_numbers = #tpu.dot_dimension_numbers<[1], [0], [0], [1], [0, 0, 1, 1], [], []>} : vector<2x4xf32>, vector<4x32xf32>, vector<2x32xf32> -> vector<2x32xf32>
    %27 = vector.broadcast %2 : vector<1x32xf32> to vector<2x32xf32>
    %28 = arith.addf %26, %27 : vector<2x32xf32>
    %29 = vector.broadcast %25 : vector<1x32xf32> to vector<2x32xf32>
    %30 = arith.addf %28, %29 : vector<2x32xf32>
    %31 = vector.extract_strided_slice %0 {offsets = [0, 16], sizes = [2, 4], strides = [1, 1]} : vector<2x32xf32> to vector<2x4xf32>
    %c12 = arith.constant 12 : index
    %c0_11 = arith.constant 0 : index
    %32 = vector.load %arg1[%c12, %c0_11] : memref<400x32xf32, #tpu.memory_space<vmem>>, vector<1x32xf32>
    %cst_12 = arith.constant dense<0.000000e+00> : vector<2x32xf32>
    %33 = tpu.matmul %31, %1, %cst_12 {dimension_numbers = #tpu.dot_dimension_numbers<[1], [0], [0], [1], [0, 0, 1, 1], [], []>} : vector<2x4xf32>, vector<4x32xf32>, vector<2x32xf32> -> vector<2x32xf32>
    %34 = vector.broadcast %2 : vector<1x32xf32> to vector<2x32xf32>
    %35 = arith.addf %33, %34 : vector<2x32xf32>
    %36 = vector.broadcast %32 : vector<1x32xf32> to vector<2x32xf32>
    %37 = arith.addf %35, %36 : vector<2x32xf32>
    %38 = vector.extract_strided_slice %0 {offsets = [0, 20], sizes = [2, 4], strides = [1, 1]} : vector<2x32xf32> to vector<2x4xf32>
    %c13 = arith.constant 13 : index
    %c0_13 = arith.constant 0 : index
    %39 = vector.load %arg1[%c13, %c0_13] : memref<400x32xf32, #tpu.memory_space<vmem>>, vector<1x32xf32>
    %cst_14 = arith.constant dense<0.000000e+00> : vector<2x32xf32>
    %40 = tpu.matmul %38, %1, %cst_14 {dimension_numbers = #tpu.dot_dimension_numbers<[1], [0], [0], [1], [0, 0, 1, 1], [], []>} : vector<2x4xf32>, vector<4x32xf32>, vector<2x32xf32> -> vector<2x32xf32>
    %41 = vector.broadcast %2 : vector<1x32xf32> to vector<2x32xf32>
    %42 = arith.addf %40, %41 : vector<2x32xf32>
    %43 = vector.broadcast %39 : vector<1x32xf32> to vector<2x32xf32>
    %44 = arith.addf %42, %43 : vector<2x32xf32>
    %45 = vector.extract_strided_slice %0 {offsets = [0, 24], sizes = [2, 4], strides = [1, 1]} : vector<2x32xf32> to vector<2x4xf32>
    %c14 = arith.constant 14 : index
    %c0_15 = arith.constant 0 : index
    %46 = vector.load %arg1[%c14, %c0_15] : memref<400x32xf32, #tpu.memory_space<vmem>>, vector<1x32xf32>
    %cst_16 = arith.constant dense<0.000000e+00> : vector<2x32xf32>
    %47 = tpu.matmul %45, %1, %cst_16 {dimension_numbers = #tpu.dot_dimension_numbers<[1], [0], [0], [1], [0, 0, 1, 1], [], []>} : vector<2x4xf32>, vector<4x32xf32>, vector<2x32xf32> -> vector<2x32xf32>
    %48 = vector.broadcast %2 : vector<1x32xf32> to vector<2x32xf32>
    %49 = arith.addf %47, %48 : vector<2x32xf32>
    %50 = vector.broadcast %46 : vector<1x32xf32> to vector<2x32xf32>
    %51 = arith.addf %49, %50 : vector<2x32xf32>
    %52 = vector.extract_strided_slice %0 {offsets = [0, 28], sizes = [2, 4], strides = [1, 1]} : vector<2x32xf32> to vector<2x4xf32>
    %c15 = arith.constant 15 : index
    %c0_17 = arith.constant 0 : index
    %53 = vector.load %arg1[%c15, %c0_17] : memref<400x32xf32, #tpu.memory_space<vmem>>, vector<1x32xf32>
    %cst_18 = arith.constant dense<0.000000e+00> : vector<2x32xf32>
    %54 = tpu.matmul %52, %1, %cst_18 {dimension_numbers = #tpu.dot_dimension_numbers<[1], [0], [0], [1], [0, 0, 1, 1], [], []>} : vector<2x4xf32>, vector<4x32xf32>, vector<2x32xf32> -> vector<2x32xf32>
    %55 = vector.broadcast %2 : vector<1x32xf32> to vector<2x32xf32>
    %56 = arith.addf %54, %55 : vector<2x32xf32>
    %57 = vector.broadcast %53 : vector<1x32xf32> to vector<2x32xf32>
    %58 = arith.addf %56, %57 : vector<2x32xf32>
    %59 = tpu.concatenate %9, %16, %23, %30, %37, %44, %51, %58 in 0 : vector<2x32xf32>, vector<2x32xf32>, vector<2x32xf32>, vector<2x32xf32>, vector<2x32xf32>, vector<2x32xf32>, vector<2x32xf32>, vector<2x32xf32> -> vector<16x32xf32>
    %60 = tpu.iota {dimensions = array<i32: 1>} : vector<16x32xi32>
    %c16 = arith.constant 16 : index
    %c0_19 = arith.constant 0 : index
    %61 = vector.load %arg1[%c16, %c0_19] : memref<400x32xf32, #tpu.memory_space<vmem>>, vector<32x32xf32>
    %cst_20 = arith.constant dense<0.000000e+00> : vector<16x32xf32>
    %62 = tpu.matmul %59, %61, %cst_20 {dimension_numbers = #tpu.dot_dimension_numbers<[1], [0], [0], [1], [0, 0, 1, 1], [], []>} : vector<16x32xf32>, vector<32x32xf32>, vector<16x32xf32> -> vector<16x32xf32>
    %c48 = arith.constant 48 : index
    %c0_21 = arith.constant 0 : index
    %63 = vector.load %arg1[%c48, %c0_21] : memref<400x32xf32, #tpu.memory_space<vmem>>, vector<1x32xf32>
    %64 = vector.broadcast %63 : vector<1x32xf32> to vector<16x32xf32>
    %65 = arith.addf %62, %64 : vector<16x32xf32>
    %c8_i32 = arith.constant 8 : i32
    %66 = vector.broadcast %c8_i32 : i32 to vector<16x32xi32>
    %67 = arith.cmpi slt, %60, %66 : vector<16x32xi32>
    %68 = math.cos %65 : vector<16x32xf32>
    %c16_i32 = arith.constant 16 : i32
    %69 = vector.broadcast %c16_i32 : i32 to vector<16x32xi32>
    %70 = arith.cmpi slt, %60, %69 : vector<16x32xi32>
    %71 = math.sin %65 : vector<16x32xf32>
    %cst_22 = arith.constant 5.000000e-01 : f32
    %72 = vector.broadcast %cst_22 : f32 to vector<16x32xf32>
    %73 = arith.mulf %72, %65 : vector<16x32xf32>
    %cst_23 = arith.constant 0.707106769 : f32
    %74 = vector.broadcast %cst_23 : f32 to vector<16x32xf32>
    %75 = arith.mulf %65, %74 : vector<16x32xf32>
    %76 = math.erf %75 : vector<16x32xf32>
    %cst_24 = arith.constant 1.000000e+00 : f32
    %77 = vector.broadcast %cst_24 : f32 to vector<16x32xf32>
    %78 = arith.addf %77, %76 : vector<16x32xf32>
    %79 = arith.mulf %73, %78 : vector<16x32xf32>
    %80 = arith.select %70, %71, %79 : vector<16x32xi1>, vector<16x32xf32>
    %81 = arith.select %67, %68, %80 : vector<16x32xi1>, vector<16x32xf32>
    %c56 = arith.constant 56 : index
    %c0_25 = arith.constant 0 : index
    %82 = vector.load %arg1[%c56, %c0_25] : memref<400x32xf32, #tpu.memory_space<vmem>>, vector<32x32xf32>
    %cst_26 = arith.constant dense<0.000000e+00> : vector<16x32xf32>
    %83 = tpu.matmul %81, %82, %cst_26 {dimension_numbers = #tpu.dot_dimension_numbers<[1], [0], [0], [1], [0, 0, 1, 1], [], []>} : vector<16x32xf32>, vector<32x32xf32>, vector<16x32xf32> -> vector<16x32xf32>
    %c88 = arith.constant 88 : index
    %c0_27 = arith.constant 0 : index
    %84 = vector.load %arg1[%c88, %c0_27] : memref<400x32xf32, #tpu.memory_space<vmem>>, vector<1x32xf32>
    %85 = vector.broadcast %84 : vector<1x32xf32> to vector<16x32xf32>
    %86 = arith.addf %83, %85 : vector<16x32xf32>
    %c8_i32_28 = arith.constant 8 : i32
    %87 = vector.broadcast %c8_i32_28 : i32 to vector<16x32xi32>
    %88 = arith.cmpi slt, %60, %87 : vector<16x32xi32>
    %89 = math.cos %86 : vector<16x32xf32>
    %c16_i32_29 = arith.constant 16 : i32
    %90 = vector.broadcast %c16_i32_29 : i32 to vector<16x32xi32>
    %91 = arith.cmpi slt, %60, %90 : vector<16x32xi32>
    %92 = math.sin %86 : vector<16x32xf32>
    %cst_30 = arith.constant 5.000000e-01 : f32
    %93 = vector.broadcast %cst_30 : f32 to vector<16x32xf32>
    %94 = arith.mulf %93, %86 : vector<16x32xf32>
    %cst_31 = arith.constant 0.707106769 : f32
    %95 = vector.broadcast %cst_31 : f32 to vector<16x32xf32>
    %96 = arith.mulf %86, %95 : vector<16x32xf32>
    %97 = math.erf %96 : vector<16x32xf32>
    %cst_32 = arith.constant 1.000000e+00 : f32
    %98 = vector.broadcast %cst_32 : f32 to vector<16x32xf32>
    %99 = arith.addf %98, %97 : vector<16x32xf32>
    %100 = arith.mulf %94, %99 : vector<16x32xf32>
    %101 = arith.select %91, %92, %100 : vector<16x32xi1>, vector<16x32xf32>
    %102 = arith.select %88, %89, %101 : vector<16x32xi1>, vector<16x32xf32>
    %cst_33 = arith.constant 0.000000e+00 : f32
    %103 = vector.broadcast %cst_33 : f32 to vector<2x32xf32>
    %c96 = arith.constant 96 : index
    %c0_34 = arith.constant 0 : index
    %104 = vector.load %arg1[%c96, %c0_34] : memref<400x32xf32, #tpu.memory_space<vmem>>, vector<32x32xf32>
    %105 = vector.extract_strided_slice %102 {offsets = [0, 0], sizes = [2, 32], strides = [1, 1]} : vector<16x32xf32> to vector<2x32xf32>
    %cst_35 = arith.constant dense<0.000000e+00> : vector<2x32xf32>
    %106 = tpu.matmul %105, %104, %cst_35 {dimension_numbers = #tpu.dot_dimension_numbers<[1], [0], [0], [1], [0, 0, 1, 1], [], []>} : vector<2x32xf32>, vector<32x32xf32>, vector<2x32xf32> -> vector<2x32xf32>
    %107 = arith.addf %103, %106 : vector<2x32xf32>
    %c128 = arith.constant 128 : index
    %c0_36 = arith.constant 0 : index
    %108 = vector.load %arg1[%c128, %c0_36] : memref<400x32xf32, #tpu.memory_space<vmem>>, vector<32x32xf32>
    %109 = vector.extract_strided_slice %102 {offsets = [2, 0], sizes = [2, 32], strides = [1, 1]} : vector<16x32xf32> to vector<2x32xf32>
    %cst_37 = arith.constant dense<0.000000e+00> : vector<2x32xf32>
    %110 = tpu.matmul %109, %108, %cst_37 {dimension_numbers = #tpu.dot_dimension_numbers<[1], [0], [0], [1], [0, 0, 1, 1], [], []>} : vector<2x32xf32>, vector<32x32xf32>, vector<2x32xf32> -> vector<2x32xf32>
    %111 = arith.addf %107, %110 : vector<2x32xf32>
    %c160 = arith.constant 160 : index
    %c0_38 = arith.constant 0 : index
    %112 = vector.load %arg1[%c160, %c0_38] : memref<400x32xf32, #tpu.memory_space<vmem>>, vector<32x32xf32>
    %113 = vector.extract_strided_slice %102 {offsets = [4, 0], sizes = [2, 32], strides = [1, 1]} : vector<16x32xf32> to vector<2x32xf32>
    %cst_39 = arith.constant dense<0.000000e+00> : vector<2x32xf32>
    %114 = tpu.matmul %113, %112, %cst_39 {dimension_numbers = #tpu.dot_dimension_numbers<[1], [0], [0], [1], [0, 0, 1, 1], [], []>} : vector<2x32xf32>, vector<32x32xf32>, vector<2x32xf32> -> vector<2x32xf32>
    %115 = arith.addf %111, %114 : vector<2x32xf32>
    %c192 = arith.constant 192 : index
    %c0_40 = arith.constant 0 : index
    %116 = vector.load %arg1[%c192, %c0_40] : memref<400x32xf32, #tpu.memory_space<vmem>>, vector<32x32xf32>
    %117 = vector.extract_strided_slice %102 {offsets = [6, 0], sizes = [2, 32], strides = [1, 1]} : vector<16x32xf32> to vector<2x32xf32>
    %cst_41 = arith.constant dense<0.000000e+00> : vector<2x32xf32>
    %118 = tpu.matmul %117, %116, %cst_41 {dimension_numbers = #tpu.dot_dimension_numbers<[1], [0], [0], [1], [0, 0, 1, 1], [], []>} : vector<2x32xf32>, vector<32x32xf32>, vector<2x32xf32> -> vector<2x32xf32>
    %119 = arith.addf %115, %118 : vector<2x32xf32>
    %c224 = arith.constant 224 : index
    %c0_42 = arith.constant 0 : index
    %120 = vector.load %arg1[%c224, %c0_42] : memref<400x32xf32, #tpu.memory_space<vmem>>, vector<32x32xf32>
    %121 = vector.extract_strided_slice %102 {offsets = [8, 0], sizes = [2, 32], strides = [1, 1]} : vector<16x32xf32> to vector<2x32xf32>
    %cst_43 = arith.constant dense<0.000000e+00> : vector<2x32xf32>
    %122 = tpu.matmul %121, %120, %cst_43 {dimension_numbers = #tpu.dot_dimension_numbers<[1], [0], [0], [1], [0, 0, 1, 1], [], []>} : vector<2x32xf32>, vector<32x32xf32>, vector<2x32xf32> -> vector<2x32xf32>
    %123 = arith.addf %119, %122 : vector<2x32xf32>
    %c256 = arith.constant 256 : index
    %c0_44 = arith.constant 0 : index
    %124 = vector.load %arg1[%c256, %c0_44] : memref<400x32xf32, #tpu.memory_space<vmem>>, vector<32x32xf32>
    %125 = vector.extract_strided_slice %102 {offsets = [10, 0], sizes = [2, 32], strides = [1, 1]} : vector<16x32xf32> to vector<2x32xf32>
    %cst_45 = arith.constant dense<0.000000e+00> : vector<2x32xf32>
    %126 = tpu.matmul %125, %124, %cst_45 {dimension_numbers = #tpu.dot_dimension_numbers<[1], [0], [0], [1], [0, 0, 1, 1], [], []>} : vector<2x32xf32>, vector<32x32xf32>, vector<2x32xf32> -> vector<2x32xf32>
    %127 = arith.addf %123, %126 : vector<2x32xf32>
    %c288 = arith.constant 288 : index
    %c0_46 = arith.constant 0 : index
    %128 = vector.load %arg1[%c288, %c0_46] : memref<400x32xf32, #tpu.memory_space<vmem>>, vector<32x32xf32>
    %129 = vector.extract_strided_slice %102 {offsets = [12, 0], sizes = [2, 32], strides = [1, 1]} : vector<16x32xf32> to vector<2x32xf32>
    %cst_47 = arith.constant dense<0.000000e+00> : vector<2x32xf32>
    %130 = tpu.matmul %129, %128, %cst_47 {dimension_numbers = #tpu.dot_dimension_numbers<[1], [0], [0], [1], [0, 0, 1, 1], [], []>} : vector<2x32xf32>, vector<32x32xf32>, vector<2x32xf32> -> vector<2x32xf32>
    %131 = arith.addf %127, %130 : vector<2x32xf32>
    %c320 = arith.constant 320 : index
    %c0_48 = arith.constant 0 : index
    %132 = vector.load %arg1[%c320, %c0_48] : memref<400x32xf32, #tpu.memory_space<vmem>>, vector<32x32xf32>
    %133 = vector.extract_strided_slice %102 {offsets = [14, 0], sizes = [2, 32], strides = [1, 1]} : vector<16x32xf32> to vector<2x32xf32>
    %cst_49 = arith.constant dense<0.000000e+00> : vector<2x32xf32>
    %134 = tpu.matmul %133, %132, %cst_49 {dimension_numbers = #tpu.dot_dimension_numbers<[1], [0], [0], [1], [0, 0, 1, 1], [], []>} : vector<2x32xf32>, vector<32x32xf32>, vector<2x32xf32> -> vector<2x32xf32>
    %135 = arith.addf %131, %134 : vector<2x32xf32>
    %c352 = arith.constant 352 : index
    %c0_50 = arith.constant 0 : index
    %136 = vector.load %arg1[%c352, %c0_50] : memref<400x32xf32, #tpu.memory_space<vmem>>, vector<1x32xf32>
    %137 = vector.broadcast %136 : vector<1x32xf32> to vector<2x32xf32>
    %138 = arith.addf %135, %137 : vector<2x32xf32>
    %cst_51 = arith.constant 0.000000e+00 : f32
    %139 = vector.broadcast %cst_51 : f32 to vector<2x32xf32>
    %140 = arith.maximumf %138, %139 : vector<2x32xf32>
    %c360 = arith.constant 360 : index
    %c0_52 = arith.constant 0 : index
    %141 = vector.load %arg1[%c360, %c0_52] : memref<400x32xf32, #tpu.memory_space<vmem>>, vector<32x32xf32>
    %cst_53 = arith.constant dense<0.000000e+00> : vector<2x32xf32>
    %142 = tpu.matmul %140, %141, %cst_53 {dimension_numbers = #tpu.dot_dimension_numbers<[1], [0], [0], [1], [0, 0, 1, 1], [], []>} : vector<2x32xf32>, vector<32x32xf32>, vector<2x32xf32> -> vector<2x32xf32>
    %c392 = arith.constant 392 : index
    %c0_54 = arith.constant 0 : index
    %143 = vector.load %arg1[%c392, %c0_54] : memref<400x32xf32, #tpu.memory_space<vmem>>, vector<1x32xf32>
    %144 = vector.broadcast %143 : vector<1x32xf32> to vector<2x32xf32>
    %145 = arith.addf %142, %144 : vector<2x32xf32>
    %146 = vector.extract_strided_slice %145 {offsets = [0, 0], sizes = [2, 8], strides = [1, 1]} : vector<2x32xf32> to vector<2x8xf32>
    %c0_55 = arith.constant 0 : index
    %c0_56 = arith.constant 0 : index
    %147 = vector.load %arg2[%c0_55, %c0_56] : memref<2x8xf32, #tpu.memory_space<vmem>>, vector<2x8xf32>
    tpu.vector_store %arg2[%c0_55, %c0_56], %146 {strides = array<i32>} : memref<2x8xf32, #tpu.memory_space<vmem>>, vector<2x8xf32>,
    return
  }
}

</mosaic_0001>

<bundles_post_ra>
// kernel: fan_forecaster_forward.1
= control target key start
LH: loop header
LB: loop body
LE: loop exit
PB: predicated region body
PF: predicated region fallthrough
CT: control target
= control target key end

     0   :  { %vm24_vm0 = vcmask 1043456   ;;  %s2916_s11 = smov 124   ;;  %s2917_s12 = smov 116   ;;  %vm20_vm1 = vcmask 31744   ;;  %v2918_v2 = vmov 0.0   ;;  %vm2919_vm2 = vmmov 0   ;;  %s3425_s0 = inlined_call_operand.vmem [shape: f32[2,32], index: 0, kind: input, shape index: {}]   ;;  %s3426_s1 = inlined_call_operand.vmem [shape: f32[400,32], index: 1, kind: input, shape index: {}]   ;;  %s3427_s2 = inlined_call_operand.hbm [shape: f32[2,8], index: 2, kind: output, shape index: {}]  }
   0x1   :  { %v12_v0 = vld [vmem:[%s3425_s0] sm:$0x3]  ;;  %2604 = vmatprep.subr.mxu1 %v2918_v2  ;;  %2606 = vmatprep.mubr.msk.f32.mxu1 %vm2919_vm2, %v2918_v2 }
   0x2   :  { %104 = vrot.lane.b32.xlu0 %v12_v0, %s2916_s11  ;;  %264 = vrot.lane.b32.xlu1 %v12_v0, %s2917_s12  ;;  %v13_v1 = vld [vmem:[%s3426_s1] sm:$0xf] }
   0x3   :  { %2605 = vmatpush3.msk.msra.mxu1 %vm24_vm0, %v13_v1  ;;  %2614 = vmatprep.subr.mxu0 %v2918_v2 }
   0x4   :  { %7 = vsyncpa [#allocation3], 0  ;;  %2607 = vmatmul.mubr.msk.f32.vlgmr.msra.gmra.mrb[0].mxu1 %vm20_vm1, %v12_v0  ;;  %2609 = vmatprep.subr.mxu1 %v2918_v2  ;;  %s2920_s0 = smov 120   ;;  %s2921_s15 = smov 112   ;;  %v691_v10 = vld [vmem:[%s3426_s1 + $0x10] sm:$0xff]  ;;  %v692_v11 = vld [vmem:[%s3426_s1 + $0x18] sm:$0xff] }
   0x5   :  { %2610 = vmatpush3.msk.msra.mxu1 %vm24_vm0, %v13_v1  ;;  %2611 = vmatprep.mubr.msk.f32.mxu1 %vm2919_vm2, %v2918_v2  ;;  %s2922_s16 = smov 108   ;;  %s2923_s17 = smov 104   ;;  %v2765_v12 = vpack.c.bf16 %v692_v11, %v691_v10  ;;  %v693_v13 = vld [vmem:[%s3426_s1 + $0x20] sm:$0xff]  ;;  %v694_v14 = vld [vmem:[%s3426_s1 + $0x28] sm:$0xff]  ;;  %vm681_vm3 = vcmask 1041408   ;;  %vm684_vm4 = vcmask 1045504  }
   0x6   :  { %184 = vrot.lane.b32.xlu0 %v12_v0, %s2920_s0  ;;  %344 = vrot.lane.b32.xlu1 %v12_v0, %s2921_s15  ;;  %s2924_s18 = smov 100   ;;  %v2769_v15 = vpack.c.bf16 %v694_v14, %v693_v13  ;;  %v2457_v18 = vld [vmem:[%s3426_s1 + $0x4] ss:$0 sm:$0xff]  ;;  %v2463_v19 = vld [vmem:[%s3426_s1 + $0x9] ss:$0 sm:$0xff]  ;;  %vm700_vm5 = vcmask 261120  }
   0x7   :  { %2619 = vmatprep.subr.mxu1 %v2918_v2  ;;  %2615 = vmatpush3.msk.msra.mxu0 %vm24_vm0, %v13_v1  ;;  %v2460_v24 = vld [vmem:[%s3426_s1 + $0x8] ss:$0 sm:$0xff]  ;;  %v2466_v26 = vld [vmem:[%s3426_s1 + $0xa] ss:$0 sm:$0xff]  ;;  %v2469_v28 = vld [vmem:[%s3426_s1 + $0xb] ss:$0 sm:$0xff] }
   0x8   :  { %2616 = vmatprep.mubr.msk.f32.mxu0 %vm2919_vm2, %v2918_v2  ;;  %2624 = vmatprep.subr.mxu0 %v2918_v2  ;;  %v2475_v40 = vld [vmem:[%s3426_s1 + $0xd] ss:$0 sm:$0xff]  ;;  %v2472_v48 = vld [vmem:[%s3426_s1 + $0xc] ss:$0 sm:$0xff]  ;;  %v2478_v51 = vld [vmem:[%s3426_s1 + $0xe] ss:$0 sm:$0xff] }
   0x9   :  { %v2481_v53 = vld [vmem:[%s3426_s1 + $0xf] ss:$0 sm:$0xff]  ;;  %v1215_v10 = vld [vmem:[%s3426_s1 + $0x50] sm:$0xff] }
   0xa   :  { %424 = vrot.lane.b32.xlu0 %v12_v0, %s2922_s16  ;;  %504 = vrot.lane.b32.xlu1 %v12_v0, %s2923_s17  ;;  %s2932_s17 = smov [#allocation2]  }
   0xe   :  { %584 = vrot.lane.b32.xlu0 %v12_v0, %s2924_s18  ;;  %s2449_s18 = sshll.u32 %s2932_s17, 4  ;;  %s2450_s18 = int_to_ptr.vmem [resolvable:$true] %s2449_s18 }
   0xf   :  { %s2892_s19 = scalar_lea.vmem %s2450_s18, 32  ;;  %p2897_p1 = scmp.lt.s32.totalorder %s2450_s18, %s2450_s18 }
  0x10   :  { %p2893_p0 = scmp.ne.s32.totalorder %s2450_s18, %s2892_s19  ;;  %p2898_p2 = scmp.lt.s32.totalorder %s2892_s19, %s2892_s19 }
  0x12   :  { %p2899_p3 = por %p2898_p2, %p2897_p1 }
  0x14   :  { %p2900_p4 = pnand %p2899_p3, %p2893_p0 }
  0x74   :  { %v105_v3 = vpop.permute.xlu0 %104  ;;  %v265_v4 = vpop.permute.xlu1 %264 }
  0x75   :  { %2612 = vmatmul.mubr.msk.f32.vlgmr.msra.gmra.mrb[2].mxu1 %vm20_vm1, %v105_v3 }
  0x76   :  { %2620 = vmatpush3.msk.msra.mxu1 %vm24_vm0, %v13_v1  ;;  %2621 = vmatprep.mubr.msk.f32.mxu1 %vm2919_vm2, %v2918_v2 }
  0x77   :  { %2629 = vmatprep.subr.mxu1 %v2918_v2 }
  0x78   :  { %v185_v5 = vpop.permute.xlu0 %184  ;;  %v345_v6 = vpop.permute.xlu1 %344 }
  0x79   :  { %2617 = vmatmul.mubr.msk.f32.vlgmr.msra.gmra.mrb[0].mxu0 %vm20_vm1, %v185_v5  ;;  %2622 = vmatmul.mubr.msk.f32.vlgmr.msra.gmra.mrb[4].mxu1 %vm20_vm1, %v265_v4 }
  0x7a   :  { %2625 = vmatpush3.msk.msra.mxu0 %vm24_vm0, %v13_v1  ;;  %2630 = vmatpush3.msk.msra.mxu1 %vm24_vm0, %v13_v1 }
  0x7b   :  { %2626 = vmatprep.mubr.msk.f32.mxu0 %vm2919_vm2, %v2918_v2  ;;  %2634 = vmatprep.subr.mxu0 %v2918_v2 }
  0x7c   :  { %v425_v7 = vpop.permute.xlu0 %424  ;;  %2631 = vmatprep.mubr.msk.f32.mxu1 %vm2919_vm2, %v2918_v2  ;;  %2639 = vmatprep.subr.mxu1 %v2918_v2  ;;  %v505_v8 = vpop.permute.xlu1 %504 }
  0x7d   :  { %2627 = vmatmul.mubr.msk.f32.vlgmr.msra.gmra.mrb[2].mxu0 %vm20_vm1, %v345_v6  ;;  %2632 = vmatmul.mubr.msk.f32.vlgmr.msra.gmra.mrb[6].mxu1 %vm20_vm1, %v425_v7  ;;  %v1212_v6 = vld [vmem:[%s3426_s1 + $0x38] sm:$0xff]  ;;  %v1213_v7 = vld [vmem:[%s3426_s1 + $0x40] sm:$0xff] }
  0x7e   :  { %2635 = vmatpush3.msk.msra.mxu0 %vm24_vm0, %v13_v1  ;;  %2640 = vmatpush3.msk.msra.mxu1 %vm24_vm0, %v13_v1 }
  0x7f   :  { %2636 = vmatprep.mubr.msk.f32.mxu0 %vm2919_vm2, %v2918_v2  ;;  %2641 = vmatprep.mubr.msk.f32.mxu1 %vm2919_vm2, %v2918_v2 }
  0x80   :  { %v585_v9 = vpop.permute.xlu0 %584  ;;  %2766 = vmatprep.subr.bf16.mxu0 %v2765_v12 }
  0x81   :  { %2637 = vmatmul.mubr.msk.f32.vlgmr.msra.gmra.mrb[4].mxu0 %vm20_vm1, %v505_v8  ;;  %2642 = vmatmul.mubr.msk.f32.vlgmr.msra.gmra.mrb[8].mxu1 %vm20_vm1, %v585_v9  ;;  %v1214_v8 = vld [vmem:[%s3426_s1 + $0x48] sm:$0xff]  ;;  %v2773_v9 = vpack.c.bf16 %v1213_v7, %v1212_v6 }
  0x82   :  { %2768 = vmatpush3.bf16.msra.mxu0 %v2765_v12  ;;  %v2777_v11 = vpack.c.bf16 %v1215_v10, %v1214_v8  ;;  %v2482_v12 = vld [vmem:[%s3426_s1 + $0x30] ss:$0 sm:$0xff] }
  0x83   :  { %2770 = vmatprep.subr.bf16.mxu0 %v2769_v15  ;;  %2774 = vmatprep.subr.bf16.mxu1 %v2773_v9 }
  0x84   :  { %2776 = vmatpush3.bf16.msra.mxu1 %v2773_v9 }
  0x85   :  { %2778 = vmatprep.subr.bf16.mxu1 %v2777_v11 }
  0x86   :  { %2772 = vmatpush3.bf16.msra.mxu0 %v2769_v15 }
  0x88   :  { %2780 = vmatpush3.bf16.msra.mxu1 %v2777_v11 }
  0xd7   :  { %v94_v16 = vpop.f32.mrb[0].mxu1 }
  0xd8   :  { %v2608_v17 = vpop.f32.mrb[1].mxu1  ;;  %v95_v21 = vadd.f32 %v2457_v18, %v94_v16 }
  0xda   :  { %v102_v30 = vadd.f32 %v2460_v24, %v95_v21 }
 0x148   :  { %v174_v20 = vpop.f32.mrb[2].mxu1 }
 0x149   :  { %v175_v22 = vadd.f32 %v2457_v18, %v174_v20  ;;  %v2613_v23 = vpop.f32.mrb[3].mxu1 }
 0x14b   :  { %v182_v25 = vadd.f32 %v2463_v19, %v175_v22 }
 0x14c   :  { %v254_v27 = vpop.f32.mrb[0].mxu0  ;;  %v334_v29 = vpop.f32.mrb[4].mxu1 }
 0x14d   :  { %v664_v31 = vrot.slane %v182_v25, 6  ;;  %v255_v32 = vadd.f32 %v2457_v18, %v254_v27  ;;  %v335_v33 = vadd.f32 %v2457_v18, %v334_v29  ;;  %v2618_v34 = vpop.f32.mrb[1].mxu0  ;;  %v2623_v35 = vpop.f32.mrb[5].mxu1 }
 0x14f   :  { %v682_v36 = vsel %vm681_vm3, %v102_v30, %v664_v31  ;;  %v262_v37 = vadd.f32 %v2466_v26, %v255_v32  ;;  %v342_v38 = vadd.f32 %v2469_v28, %v335_v33 }
 0x150   :  { %v414_v39 = vpop.f32.mrb[2].mxu0  ;;  %v494_v41 = vpop.f32.mrb[6].mxu1 }
 0x151   :  { %v667_v42 = vrot.slane %v262_v37, 4  ;;  %v670_v43 = vrot.slane %v342_v38, 2  ;;  %v415_v44 = vadd.f32 %v2457_v18, %v414_v39  ;;  %v495_v45 = vadd.f32 %v2457_v18, %v494_v41  ;;  %v2628_v46 = vpop.f32.mrb[3].mxu0  ;;  %v2633_v47 = vpop.f32.mrb[7].mxu1 }
 0x152   :  { %v2927_v46 = vmov 2131351028  }
 0x153   :  { %v502_v49 = vadd.f32 %v2475_v40, %v495_v45  ;;  %v683_v50 = vsel %vm24_vm0, %v682_v36, %v667_v42  ;;  %v422_v56 = vadd.f32 %v2472_v48, %v415_v44  ;;  %v2925_v40 = vmov 683565275  }
 0x154   :  { %v574_v52 = vpop.f32.mrb[4].mxu0  ;;  %v654_v54 = vpop.f32.mrb[8].mxu1  ;;  %v685_v55 = vsel %vm684_vm4, %v683_v50, %v670_v43  ;;  %v2926_v42 = vmov 2475754826   ;;  %v2928_v48 = vmov 2102212464  }
 0x155   :  { %v673_v57 = vrot.slane %v502_v49, 6  ;;  %v575_v58 = vadd.f32 %v2457_v18, %v574_v52  ;;  %v655_v59 = vadd.f32 %v2457_v18, %v654_v54  ;;  %v2638_v60 = vpop.f32.mrb[5].mxu0  ;;  %v2643_v61 = vpop.f32.mrb[9].mxu1  ;;  %2652 = vmatprep.mubr.msk.f32.mxu0 %vm700_vm5, %v685_v55 }
 0x157   :  { %v686_v62 = vsel %vm681_vm3, %v422_v56, %v673_v57  ;;  %v582_v63 = vadd.f32 %v2478_v51, %v575_v58  ;;  %v662_v0 = vadd.f32 %v2481_v53, %v655_v59  ;;  %v2929_v53 = vmov 920167782  }
 0x158   :  { %v2930_v57 = vmov 1326507024  }
 0x159   :  { %v676_v1 = vrot.slane %v582_v63, 4  ;;  %v679_v3 = vrot.slane %v662_v0, 2 }
 0x15b   :  { %v687_v4 = vsel %vm24_vm0, %v686_v62, %v676_v1 }
 0x15c   :  { %v688_v5 = vsel %vm684_vm4, %v687_v4, %v679_v3 }
 0x15d   :  { %2653 = vmatmul.mubr.msk.f32.vlgmr.msra.gmra.mrb[6].mxu0 %vm700_vm5, %v688_v5 }
 0x15e   :  { %2674 = vmatprep.mubr.msk.f32.mxu0 %vm2919_vm2, %v2918_v2 }
 0x230   :  { %v2654_v13 = vpop.f32.mrb[6].mxu0 }
 0x231   :  { %v3058_v14 = vadd.f32 %v2654_v13, %v2482_v12  ;;  %v773_v15 = vpop.f32.mrb[7].mxu0 }
 0x232   :  { %v3060_v16 = vadd.f32 %v2482_v12, %v773_v15 }
 0x233   :  { %v889_v17 = vand.u32 2139095040, %v3058_v14  ;;  %v886_v24 = vand.u32 2147483647, %v3058_v14 }
 0x234   :  { %v786_v18 = vand.u32 2139095040, %v3060_v16  ;;  %v783_v19 = vand.u32 2147483647, %v3060_v16 }
 0x235   :  { %v890_v20 = vshrl.u32 %v889_v17, 23  ;;  %v3070_v29 = vand.u32 8388607, %v886_v24 }
 0x236   :  { %v787_v21 = vshrl.u32 %v786_v18, 23  ;;  %v790_v23 = vand.u32 8388607, %v783_v19 }
 0x237   :  { %v2489_v22 = vadd.s32 4294967169, %v890_v20  ;;  %v894_v37 = vor.u32 8388608, %v3070_v29 }
 0x238   :  { %v2485_v25 = vadd.s32 4294967169, %v787_v21  ;;  %v791_v28 = vor.u32 8388608, %v790_v23 }
 0x239   :  { %v896_v26 = vadd.s32 1, %v2489_v22 }
 0x23a   :  { %v793_v27 = vadd.s32 1, %v2485_v25  ;;  %v3074_v36 = vshll.u32 %v791_v28, 8 }
 0x23b   :  { %vm897_vm6 = vcmp.gt.s32.totalorder %v896_v26, 0 }
 0x23c   :  { %v898_v30 = vsel %vm897_vm6, %v896_v26, 0  ;;  %vm794_vm7 = vcmp.gt.s32.totalorder %v793_v27, 0  ;;  %vm785_vm6 = vcmp.lt.s32.totalorder %v3060_v16, 0 }
 0x23d   :  { %v900_v31 = vand.u32 31, %v898_v30  ;;  %v795_v32 = vsel %vm794_vm7, %v793_v27, 0  ;;  %v3072_v34 = vshrl.u32 %v898_v30, 5  ;;  %vm784_vm7 = vcmp.le.f32.partialorder %v783_v19, 0.7853982 }
 0x23e   :  { %v797_v33 = vand.u32 31, %v795_v32  ;;  %v796_v35 = vshrl.u32 %v795_v32, 5 }
 0x23f   :  { %v901_v38 = vsub.s32 32, %v900_v31  ;;  %v903_v41 = vshll.u32 %v2925_v40, %v900_v31  ;;  %v906_v43 = vshll.u32 %v2926_v42, %v900_v31  ;;  %v909_v12 = vshll.u32 %v2927_v46, %v900_v31 }
 0x240   :  { %v798_v39 = vsub.s32 32, %v797_v33  ;;  %v800_v44 = vshll.u32 %v2925_v40, %v797_v33  ;;  %v803_v45 = vshll.u32 %v2926_v42, %v797_v33  ;;  %v806_v47 = vshll.u32 %v2927_v46, %v797_v33 }
 0x241   :  { %v809_v49 = vshll.u32 %v2928_v48, %v797_v33  ;;  %v812_v54 = vshll.u32 %v2929_v53, %v797_v33  ;;  %vm815_vm8 = vcmp.lt.s32.totalorder %v796_v35, 1  ;;  %vm817_vm9 = vcmp.lt.s32.totalorder %v796_v35, 3 }
 0x242   :  { %v801_v50 = vshrl.u32 %v2926_v42, %v798_v39  ;;  %v804_v51 = vshrl.u32 %v2927_v46, %v798_v39  ;;  %v807_v52 = vshrl.u32 %v2928_v48, %v798_v39  ;;  %v799_v55 = vshrl.u32 %v2925_v40, %v798_v39 }
 0x243   :  { %v810_v56 = vshrl.u32 %v2929_v53, %v798_v39  ;;  %v813_v58 = vshrl.u32 %v2930_v57, %v798_v39  ;;  %vm818_vm10 = vcmp.lt.s32.totalorder %v796_v35, 4  ;;  %v904_v0 = vshrl.u32 %v2926_v42, %v901_v38 }
 0x244   :  { %v802_v59 = vor.u32 %v801_v50, %v800_v44  ;;  %v805_v60 = vor.u32 %v804_v51, %v803_v45  ;;  %v808_v61 = vor.u32 %v807_v52, %v806_v47  ;;  %vm816_vm11 = vcmp.lt.s32.totalorder %v796_v35, 2 }
 0x245   :  { %v811_v62 = vor.u32 %v810_v56, %v809_v49  ;;  %v814_v63 = vor.u32 %v813_v58, %v812_v54  ;;  %v905_v17 = vor.u32 %v904_v0, %v903_v41  ;;  %v907_v18 = vshrl.u32 %v2927_v46, %v901_v38 }
 0x246   :  { %v819_v1 = vsel %vm815_vm8, %v799_v55, %v802_v59  ;;  %v820_v3 = vsel %vm818_vm10, %v808_v61, 2102212464  ;;  %v823_v4 = vsel %vm815_vm8, %v802_v59, %v805_v60  ;;  %v827_v5 = vsel %vm815_vm8, %v805_v60, %v808_v61 }
 0x247   :  { %v821_v6 = vsel %vm817_vm9, %v805_v60, %v820_v3  ;;  %v824_v7 = vsel %vm818_vm10, %v811_v62, 920167782  ;;  %v828_v8 = vsel %vm818_vm10, %v814_v63, 1326507024  ;;  %v908_v25 = vor.u32 %v907_v18, %v906_v43 }
 0x248   :  { %v822_v9 = vsel %vm816_vm11, %v819_v1, %v821_v6  ;;  %v825_v10 = vsel %vm817_vm9, %v808_v61, %v824_v7  ;;  %v829_v11 = vsel %vm817_vm9, %v811_v62, %v828_v8  ;;  %v910_v26 = vshrl.u32 %v2928_v48, %v901_v38 }
 0x249   :  { %v826_v13 = vsel %vm816_vm11, %v823_v4, %v825_v10  ;;  %v830_v15 = vsel %vm816_vm11, %v827_v5, %v829_v11  ;;  %v912_v27 = vshll.u32 %v2928_v48, %v900_v31  ;;  %v913_v28 = vshrl.u32 %v2929_v53, %v901_v38 }
 0x24a   :  { %v3094_v20 = vmul.u32.u64.low %v3074_v36, %v830_v15  ;;  %v3095_v21 = vmul.u32.u64.high %v3074_v36, %v830_v15, %v3094_v20  ;;  %v3098_v22 = vmul.u32.u64.low %v3074_v36, %v826_v13  ;;  %v3099_v23 = vmul.u32.u64.high %v3074_v36, %v826_v13, %v3098_v22 }
 0x24b   :  { %v902_v29 = vshrl.u32 %v2925_v40, %v901_v38  ;;  %v915_v30 = vshll.u32 %v2929_v53, %v900_v31  ;;  %v916_v32 = vshrl.u32 %v2930_v57, %v901_v38  ;;  %v934_v33 = vshll.u32 %v894_v37, 8 }
 0x24c   :  { %v838_v35 = vmul.u32 %v3074_v36, %v822_v9  ;;  %v911_v39 = vor.u32 %v910_v26, %v909_v12  ;;  %v914_v41 = vor.u32 %v913_v28, %v912_v27  ;;  %vm918_vm12 = vcmp.lt.s32.totalorder %v3072_v34, 1 }
 0x24d   :  { %vm840_vm13 = vc.u32 %v3095_v21, %v3098_v22  ;;  %v841_v43 = vadd.s32 1, %v3099_v23  ;;  %v917_v44 = vor.u32 %v916_v32, %v915_v30  ;;  %vm921_vm14 = vcmp.lt.s32.totalorder %v3072_v34, 4 }
 0x24e   :  { %vm920_vm15 = vcmp.lt.s32.totalorder %v3072_v34, 3  ;;  %v923_v45 = vsel %vm921_vm14, %v911_v39, 2102212464  ;;  %v926_v31 = vsel %vm918_vm12, %v905_v17, %v908_v25  ;;  %v927_v47 = vsel %vm921_vm14, %v914_v41, 920167782 }
 0x24f   :  { %v842_v37 = vsel %vm840_vm13, %v841_v43, %v3099_v23  ;;  %vm919_vm0 = vcmp.lt.s32.totalorder %v3072_v34, 2  ;;  %v928_v36 = vsel %vm920_vm15, %v911_v39, %v927_v47  ;;  %v930_v38 = vsel %vm918_vm12, %v908_v25, %v911_v39 }
 0x250   :  { %v843_v49 = vadd.s32 %v842_v37, %v838_v35  ;;  %v922_v50 = vsel %vm918_vm12, %v902_v29, %v905_v17  ;;  %v929_v51 = vsel %vm919_vm0, %v926_v31, %v928_v36  ;;  %v931_v52 = vsel %vm921_vm14, %v917_v44, 1326507024 }
 0x251   :  { %v924_v54 = vsel %vm920_vm15, %v908_v25, %v923_v45  ;;  %v932_v55 = vsel %vm920_vm15, %v914_v41, %v931_v52  ;;  %v3115_v56 = vmul.u32.u64.low %v934_v33, %v929_v51  ;;  %v3116_v58 = vmul.u32.u64.high %v934_v33, %v929_v51, %v3115_v56 }
 0x252   :  { %v844_v59 = vadd.s32 536870912, %v843_v49  ;;  %v933_v60 = vsel %vm919_vm0, %v930_v38, %v932_v55  ;;  %v925_v0 = vsel %vm919_vm0, %v922_v50, %v924_v54  ;;  %v839_v20 = vadd.s32 %v3098_v22, %v3095_v21 }
 0x253   :  { %v3118_v61 = vmul.u32.u64.low %v934_v33, %v933_v60  ;;  %v3119_v62 = vmul.u32.u64.high %v934_v33, %v933_v60, %v3118_v61  ;;  %v944_v34 = vadd.s32 1, %v3116_v58  ;;  %v941_v3 = vmul.u32 %v934_v33, %v925_v0 }
 0x254   :  { %v845_v63 = vshrl.u32 %v844_v59, 30  ;;  %v1200_v37 = vmul.f32 0.70710677, %v3060_v16  ;;  %vm888_vm8 = vcmp.lt.s32.totalorder %v3058_v14, 0  ;;  %vm887_vm9 = vcmp.le.f32.partialorder %v886_v24, 0.7853982 }
 0x255   :  { %vm943_vm1 = vc.u32 %v3119_v62, %v3115_v56  ;;  %v942_v45 = vadd.s32 %v3115_v56, %v3119_v62  ;;  %v689_v62 = vlaneseq  ;;  %v1198_v24 = vmul.f32 0.5, %v3060_v16 }
 0x256   :  { %v846_v1 = vshll.u32 %v845_v63, 30  ;;  %v945_v5 = vsel %vm943_vm1, %v944_v34, %v3116_v58  ;;  %v869_v22 = vsub.s32 4, %v845_v63  ;;  %2868 = verf.f32 %v1200_v37 }
 0x257   :  { %v946_v6 = vadd.s32 %v945_v5, %v941_v3  ;;  %v3132_v5 = vand.u32 127, %v689_v62  ;;  %v1735_v62 = vld [vmem:[%s3426_s1 + $0x88] sm:$0xff] }
 0x258   :  { %v847_v4 = vsub.s32 %v843_v49, %v846_v1  ;;  %v870_v55 = vsel %vm785_vm6, %v869_v22, %v845_v63  ;;  %v1201_v1 = vmul.f32 0.70710677, %v3058_v14 }
 0x259   :  { %v947_v8 = vadd.s32 536870912, %v946_v6  ;;  %v872_v59 = vsel %vm784_vm7, 0, %v870_v55  ;;  %vm782_vm10 = vcmp.lt.s32.totalorder %v3132_v5, 8  ;;  %vm989_vm11 = vcmp.lt.s32.totalorder %v3132_v5, 16  ;;  %v2118_v5 = vld [vmem:[%s3426_s1 + $0x100] sm:$0xff] }
 0x25a   :  { %v849_v7 = vsub.s32 0, %v847_v4  ;;  %v1083_v3 = vadd.s32 3, %v872_v59 }
 0x25b   :  { %v948_v10 = vshrl.u32 %v947_v8, 30 }
 0x25c   :  { %v2486_v9 = vmin.u32 %v849_v7, %v847_v4  ;;  %v876_v7 = vand.u32 3, %v872_v59  ;;  %v1084_v8 = vand.u32 3, %v1083_v3  ;;  %v1734_v59 = vld [vmem:[%s3426_s1 + $0x80] sm:$0xff]  ;;  %v1736_v3 = vld [vmem:[%s3426_s1 + $0x90] sm:$0xff] }
 0x25d   :  { %v949_v12 = vshll.u32 %v948_v10, 30  ;;  %v972_v34 = vsub.s32 4, %v948_v10 }
 0x25e   :  { %v851_v11 = vclz %v2486_v9  ;;  %vm878_vm12 = vcmp.eq.s32.totalorder %v876_v7, 0  ;;  %vm881_vm13 = vcmp.eq.s32.totalorder %v876_v7, 2  ;;  %vm1089_vm14 = vcmp.eq.s32.totalorder %v1084_v8, 2 }
 0x25f   :  { %v950_v15 = vsub.s32 %v946_v6, %v949_v12  ;;  %v973_v63 = vsel %vm888_vm8, %v972_v34, %v948_v10  ;;  %vm1086_vm15 = vcmp.eq.s32.totalorder %v1084_v8, 0  ;;  %vm877_vm0 = vcmp.lt.s32.totalorder %v876_v7, 2  ;;  %v1733_v34 = vld [vmem:[%s3426_s1 + $0x78] sm:$0xff] }
 0x260   :  { %v2487_v13 = vadd.s32 4294967294, %v851_v11  ;;  %v2869_v6 = vpop.eup %2868  ;;  %v975_v12 = vsel %vm887_vm9, 0, %v973_v63  ;;  %vm1085_vm1 = vcmp.lt.s32.totalorder %v1084_v8, 2 }
 0x261   :  { %v952_v18 = vsub.s32 0, %v950_v15 }
 0x262   :  { %vm2488_vm3 = vcmp.lt.s32.totalorder %v2487_v13, 0 }
 0x263   :  { %v854_v17 = vsel %vm2488_vm3, 0, %v2487_v13  ;;  %v2490_v26 = vmin.u32 %v952_v18, %v950_v15  ;;  %vm875_vm3 = vweird.f32 %v3060_v16 }
 0x264   :  { %v855_v23 = vsub.s32 32, %v854_v17  ;;  %v859_v25 = vsub.s32 4294967266, %v854_v17  ;;  %v856_v27 = vshll.u32 %v847_v4, %v854_v17  ;;  %v1204_v17 = vadd.f32 1.0, %v2869_v6  ;;  %v2501_v6 = vld [vmem:[%s3426_s1 + $0x58] ss:$0 sm:$0xff] }
 0x265   :  { %v954_v30 = vclz %v2490_v26 }
 0x266   :  { %v857_v28 = vshrl.u32 %v839_v20, %v855_v23  ;;  %v860_v29 = vadd.s32 127, %v859_v25  ;;  %v1187_v23 = vadd.s32 3, %v975_v12 }
 0x267   :  { %v2491_v35 = vadd.s32 4294967294, %v954_v30 }
 0x268   :  { %v858_v32 = vor.u32 %v857_v28, %v856_v27  ;;  %v861_v33 = vshll.u32 %v860_v29, 23  ;;  %v1206_v29 = vmul.f32 %v1204_v17, %v1198_v24 }
 0x269   :  { %vm2492_vm4 = vcmp.lt.s32.totalorder %v2491_v35, 0 }
 0x26a   :  { %v862_v39 = vor.u32 4788187, %v861_v33  ;;  %v865_v43 = vcvt.s32.f32 %v858_v32  ;;  %v957_v44 = vsel %vm2492_vm4, 0, %v2491_v35 }
 0x26b   :  { %v958_v31 = vsub.s32 32, %v957_v44  ;;  %v962_v47 = vsub.s32 4294967266, %v957_v44  ;;  %v959_v36 = vshll.u32 %v950_v15, %v957_v44 }
 0x26c   :  { %v863_v41 = vand.u32 2147483647, %v862_v39  ;;  %v979_v39 = vand.u32 3, %v975_v12 }
 0x26d   :  { %v960_v38 = vshrl.u32 %v942_v45, %v958_v31  ;;  %v963_v49 = vadd.s32 127, %v962_v47 }
 0x26e   :  { %v866_v21 = vmul.f32 %v865_v43, %v863_v41  ;;  %v1188_v41 = vand.u32 3, %v1187_v23  ;;  %vm984_vm4 = vcmp.eq.s32.totalorder %v979_v39, 2 }
 0x26f   :  { %v961_v51 = vor.u32 %v960_v38, %v959_v36  ;;  %v964_v52 = vshll.u32 %v963_v49, 23 }
 0x270   :  { %v867_v50 = vxor.u32 2147483648, %v866_v21 }
 0x271   :  { %v965_v58 = vor.u32 4788187, %v964_v52  ;;  %v968_v61 = vcvt.s32.f32 %v961_v51 }
 0x272   :  { %v868_v54 = vsel %vm785_vm6, %v867_v50, %v866_v21  ;;  %vm1193_vm6 = vcmp.eq.s32.totalorder %v1188_v41, 2  ;;  %v1199_v21 = vmul.f32 0.5, %v3058_v14 }
 0x273   :  { %v871_v56 = vsel %vm784_vm7, %v3060_v16, %v868_v54  ;;  %v966_v60 = vand.u32 2147483647, %v965_v58  ;;  %vm981_vm7 = vcmp.eq.s32.totalorder %v979_v39, 0  ;;  %v1731_v58 = vld [vmem:[%s3426_s1 + $0x68] sm:$0xff] }
 0x274   :  { %2870 = vcosq.f32 %v871_v56 }
 0x275   :  { %2872 = vsinq.f32 %v871_v56  ;;  %v969_v0 = vmul.f32 %v968_v61, %v966_v60  ;;  %v2931_v60 = vmov 0.0|0.0  }
 0x276   :  { %2874 = verf.f32 %v1201_v1  ;;  %2787 = vmatprep.subr.bf16.mxu1 %v2931_v60  ;;  %2781 = vmatprep.subr.bf16.mxu0 %v2931_v60  ;;  %v2782_v1 = vpack.c.bf16 %v1735_v62, %v1734_v59 }
 0x277   :  { %v970_v4 = vxor.u32 2147483648, %v969_v0 }
 0x278   :  { %2783 = vmatpush3.bf16.msra.mxu0 %v2782_v1 }
 0x279   :  { %v971_v19 = vsel %vm888_vm8, %v970_v4, %v969_v0  ;;  %vm1190_vm8 = vcmp.eq.s32.totalorder %v1188_v41, 0  ;;  %v1732_v0 = vld [vmem:[%s3426_s1 + $0x70] sm:$0xff]  ;;  %v1737_v4 = vld [vmem:[%s3426_s1 + $0x98] sm:$0xff]  ;;  %2784 = vmatprep.subr.bf16.mxu0 %v2931_v60 }
 0x27a   :  { %v974_v9 = vsel %vm887_vm9, %v3058_v14, %v971_v19  ;;  %vm980_vm9 = vcmp.lt.s32.totalorder %v979_v39, 2  ;;  %v2791_v19 = vpack.c.bf16 %v1733_v34, %v1732_v0  ;;  %v2785_v63 = vpack.c.bf16 %v1737_v4, %v1736_v3 }
 0x27b   :  { %2876 = vcosq.f32 %v974_v9 }
 0x27c   :  { %2878 = vsinq.f32 %v974_v9  ;;  %2786 = vmatpush3.bf16.msra.mxu0 %v2785_v63 }
 0x27d   :  { %2793 = vmatprep.subr.bf16.mxu0 %v2931_v60 }
 0x27e   :  { %v2871_v11 = vpop.eup %2870 }
 0x27f   :  { %v2873_v13 = vpop.eup %2872  ;;  %v882_v15 = vxor.u32 2147483648, %v2871_v11 }
 0x280   :  { %v879_v10 = vxor.u32 2147483648, %v2873_v13  ;;  %v2875_v33 = vpop.eup %2874 }
 0x281   :  { %v883_v18 = vsel %vm881_vm13, %v882_v15, %v2873_v13  ;;  %v1091_v20 = vsel %vm1089_vm14, %v882_v15, %v2873_v13  ;;  %v1205_v16 = vadd.f32 1.0, %v2875_v33  ;;  %vm978_vm13 = vweird.f32 %v3058_v14  ;;  %v1730_v14 = vld [vmem:[%s3426_s1 + $0x60] sm:$0xff] }
 0x282   :  { %v880_v25 = vsel %vm878_vm12, %v2871_v11, %v879_v10  ;;  %v1088_v26 = vsel %vm1086_vm15, %v2871_v11, %v879_v10  ;;  %vm1189_vm12 = vcmp.lt.s32.totalorder %v1188_v41, 2  ;;  %v2788_v61 = vpack.c.bf16 %v1731_v58, %v1730_v14 }
 0x283   :  { %v884_v27 = vsel %vm877_vm0, %v880_v25, %v883_v18  ;;  %v1092_v28 = vsel %vm1085_vm1, %v1088_v26, %v1091_v20  ;;  %v1207_v51 = vmul.f32 %v1205_v16, %v1199_v21 }
 0x284   :  { %v885_v30 = vsel %vm875_vm3, nan, %v884_v27  ;;  %v1093_v32 = vsel %vm875_vm3, nan, %v1092_v28 }
 0x285   :  { %v1208_v35 = vsel %vm989_vm11, %v1093_v32, %v1206_v29  ;;  %v2877_v44 = vpop.eup %2876 }
 0x286   :  { %v1210_v43 = vsel %vm782_vm10, %v885_v30, %v1208_v35  ;;  %v2879_v45 = vpop.eup %2878  ;;  %v985_v31 = vxor.u32 2147483648, %v2877_v44 }
 0x287   :  { %2663 = vmatprep.mubr.msk.f32.mxu1 %vm700_vm5, %v1210_v43  ;;  %v982_v47 = vxor.u32 2147483648, %v2879_v45 }
 0x288   :  { %v986_v22 = vsel %vm984_vm4, %v985_v31, %v2879_v45  ;;  %v1195_v37 = vsel %vm1193_vm6, %v985_v31, %v2879_v45 }
 0x289   :  { %v983_v36 = vsel %vm981_vm7, %v2877_v44, %v982_v47  ;;  %v1192_v38 = vsel %vm1190_vm8, %v2877_v44, %v982_v47 }
 0x28a   :  { %v987_v49 = vsel %vm980_vm9, %v983_v36, %v986_v22  ;;  %v1196_v50 = vsel %vm1189_vm12, %v1192_v38, %v1195_v37 }
 0x28b   :  { %v988_v52 = vsel %vm978_vm13, nan, %v987_v49  ;;  %v1197_v54 = vsel %vm978_vm13, nan, %v1196_v50 }
 0x28c   :  { %v1209_v55 = vsel %vm989_vm11, %v1197_v54, %v1207_v51 }
 0x28d   :  { %v1211_v56 = vsel %vm782_vm10, %v988_v52, %v1209_v55 }
 0x28e   :  { %2664 = vmatmul.mubr.msk.f32.vlgmr.msra.gmra.mrb[10].mxu1 %vm700_vm5, %v1211_v56 }
 0x28f   :  { %2685 = vmatprep.mubr.msk.f32.mxu1 %vm2919_vm2, %v2918_v2  ;;  %2789 = vmatpush3.bf16.msra.mxu1 %v2788_v61 }
 0x290   :  { %2790 = vmatprep.subr.bf16.mxu1 %v2931_v60 }
 0x293   :  { %2792 = vmatpush3.bf16.msra.mxu1 %v2791_v19 }
 0x294   :  { %2799 = vmatprep.subr.bf16.mxu1 %v2931_v60 }
 0x361   :  { %v2665_v7 = vpop.f32.mrb[10].mxu1 }
 0x362   :  { %v3189_v8 = vadd.f32 %v2665_v7, %v2501_v6  ;;  %v1293_v9 = vpop.f32.mrb[11].mxu1 }
 0x363   :  { %v3191_v11 = vadd.f32 %v2501_v6, %v1293_v9 }
 0x364   :  { %v1405_v12 = vand.u32 2147483647, %v3189_v8  ;;  %v1408_v13 = vand.u32 2139095040, %v3189_v8 }
 0x365   :  { %v1305_v15 = vand.u32 2139095040, %v3191_v11  ;;  %v1302_v18 = vand.u32 2147483647, %v3191_v11 }
 0x366   :  { %v1409_v24 = vshrl.u32 %v1408_v13, 23  ;;  %v1412_v17 = vand.u32 8388607, %v1405_v12 }
 0x367   :  { %v1306_v10 = vshrl.u32 %v1305_v15, 23  ;;  %v1309_v28 = vand.u32 8388607, %v1302_v18 }
 0x368   :  { %v2508_v20 = vadd.s32 4294967169, %v1409_v24  ;;  %v1413_v26 = vor.u32 8388608, %v1412_v17 }
 0x369   :  { %v2504_v23 = vadd.s32 4294967169, %v1306_v10  ;;  %v1310_v39 = vor.u32 8388608, %v1309_v28 }
 0x36a   :  { %v1415_v25 = vadd.s32 1, %v2508_v20  ;;  %v3201_v35 = vshll.u32 %v1413_v26, 8 }
 0x36b   :  { %v1312_v27 = vadd.s32 1, %v2504_v23 }
 0x36c   :  { %vm1416_vm14 = vcmp.gt.s32.totalorder %v1415_v25, 0 }
 0x36d   :  { %v1417_v29 = vsel %vm1416_vm14, %v1415_v25, 0  ;;  %vm1313_vm15 = vcmp.gt.s32.totalorder %v1312_v27, 0 }
 0x36e   :  { %v1418_v30 = vshrl.u32 %v1417_v29, 5  ;;  %v1419_v32 = vand.u32 31, %v1417_v29  ;;  %v1314_v33 = vsel %vm1313_vm15, %v1312_v27, 0 }
 0x36f   :  { %v3204_v44 = vshrl.u32 %v1314_v33, 5  ;;  %v1316_v45 = vand.u32 31, %v1314_v33 }
 0x370   :  { %v1420_v41 = vsub.s32 32, %v1419_v32  ;;  %v1422_v43 = vshll.u32 %v2925_v40, %v1419_v32  ;;  %v1425_v31 = vshll.u32 %v2926_v42, %v1419_v32  ;;  %v1428_v16 = vshll.u32 %v2927_v46, %v1419_v32 }
 0x371   :  { %v1431_v47 = vshll.u32 %v2928_v48, %v1419_v32  ;;  %v1434_v21 = vshll.u32 %v2929_v53, %v1419_v32  ;;  %vm1437_vm0 = vcmp.lt.s32.totalorder %v1418_v30, 1  ;;  %vm1438_vm1 = vcmp.lt.s32.totalorder %v1418_v30, 2 }
 0x372   :  { %v1423_v22 = vshrl.u32 %v2926_v42, %v1420_v41  ;;  %v1426_v37 = vshrl.u32 %v2927_v46, %v1420_v41  ;;  %v1429_v36 = vshrl.u32 %v2928_v48, %v1420_v41  ;;  %v1421_v38 = vshrl.u32 %v2925_v40, %v1420_v41 }
 0x373   :  { %v1432_v49 = vshrl.u32 %v2929_v53, %v1420_v41  ;;  %v1435_v50 = vshrl.u32 %v2930_v57, %v1420_v41  ;;  %v1317_v55 = vsub.s32 32, %v1316_v45  ;;  %vm1439_vm3 = vcmp.lt.s32.totalorder %v1418_v30, 3 }
 0x374   :  { %v1424_v51 = vor.u32 %v1423_v22, %v1422_v43  ;;  %v1427_v52 = vor.u32 %v1426_v37, %v1425_v31  ;;  %v1430_v54 = vor.u32 %v1429_v36, %v1428_v16  ;;  %vm1440_vm4 = vcmp.lt.s32.totalorder %v1418_v30, 4 }
 0x375   :  { %v1433_v56 = vor.u32 %v1432_v49, %v1431_v47  ;;  %v1436_v14 = vor.u32 %v1435_v50, %v1434_v21  ;;  %v1319_v3 = vshll.u32 %v2925_v40, %v1316_v45  ;;  %v1320_v63 = vshrl.u32 %v2926_v42, %v1317_v55 }
 0x376   :  { %v1441_v58 = vsel %vm1437_vm0, %v1421_v38, %v1424_v51  ;;  %v1442_v59 = vsel %vm1440_vm4, %v1430_v54, 2102212464  ;;  %v1445_v61 = vsel %vm1437_vm0, %v1424_v51, %v1427_v52  ;;  %v1449_v62 = vsel %vm1437_vm0, %v1427_v52, %v1430_v54 }
 0x377   :  { %v1443_v0 = vsel %vm1439_vm3, %v1427_v52, %v1442_v59  ;;  %v1446_v34 = vsel %vm1440_vm4, %v1433_v56, 920167782  ;;  %v1450_v1 = vsel %vm1440_vm4, %v1436_v14, 1326507024  ;;  %v1322_v6 = vshll.u32 %v2926_v42, %v1316_v45 }
 0x378   :  { %v1447_v4 = vsel %vm1439_vm3, %v1430_v54, %v1446_v34  ;;  %v1451_v19 = vsel %vm1439_vm3, %v1433_v56, %v1450_v1  ;;  %v1444_v7 = vsel %vm1438_vm1, %v1441_v58, %v1443_v0  ;;  %v1323_v15 = vshrl.u32 %v2927_v46, %v1317_v55 }
 0x379   :  { %v1448_v9 = vsel %vm1438_vm1, %v1445_v61, %v1447_v4  ;;  %v1452_v13 = vsel %vm1438_vm1, %v1449_v62, %v1451_v19  ;;  %v1321_v23 = vor.u32 %v1320_v63, %v1319_v3  ;;  %v1325_v42 = vshll.u32 %v2927_v46, %v1316_v45 }
 0x37a   :  { %v3227_v24 = vmul.u32.u64.low %v3201_v35, %v1452_v13  ;;  %v3228_v17 = vmul.u32.u64.high %v3201_v35, %v1452_v13, %v3227_v24  ;;  %v3231_v10 = vmul.u32.u64.low %v3201_v35, %v1448_v9  ;;  %v3232_v20 = vmul.u32.u64.high %v3201_v35, %v1448_v9, %v3231_v10 }
 0x37b   :  { %v1324_v25 = vor.u32 %v1323_v15, %v1322_v6  ;;  %v1326_v26 = vshrl.u32 %v2928_v48, %v1317_v55  ;;  %v1328_v27 = vshll.u32 %v2928_v48, %v1316_v45  ;;  %v1329_v28 = vshrl.u32 %v2929_v53, %v1317_v55 }
 0x37c   :  { %v1332_v29 = vshrl.u32 %v2930_v57, %v1317_v55  ;;  %v1350_v30 = vshll.u32 %v1310_v39, 8  ;;  %v1460_v32 = vmul.u32 %v3201_v35, %v1444_v7  ;;  %v1318_v33 = vshrl.u32 %v2925_v40, %v1317_v55 }
 0x37d   :  { %v1327_v41 = vor.u32 %v1326_v26, %v1325_v42  ;;  %v1331_v43 = vshll.u32 %v2929_v53, %v1316_v45  ;;  %vm1462_vm6 = vc.u32 %v3228_v17, %v3231_v10  ;;  %v1463_v46 = vadd.s32 1, %v3232_v20 }
 0x37e   :  { %v1330_v31 = vor.u32 %v1329_v28, %v1328_v27  ;;  %vm1334_vm7 = vcmp.lt.s32.totalorder %v3204_v44, 1  ;;  %vm1336_vm8 = vcmp.lt.s32.totalorder %v3204_v44, 3  ;;  %vm1337_vm9 = vcmp.lt.s32.totalorder %v3204_v44, 4 }
 0x37f   :  { %v1333_v48 = vor.u32 %v1332_v29, %v1331_v43  ;;  %v1342_v57 = vsel %vm1334_vm7, %v1321_v23, %v1324_v25  ;;  %v1464_v35 = vsel %vm1462_vm6, %v1463_v46, %v3232_v20  ;;  %v1339_v39 = vsel %vm1337_vm9, %v1327_v41, 2102212464 }
 0x380   :  { %v1343_v40 = vsel %vm1337_vm9, %v1330_v31, 920167782  ;;  %v1346_v16 = vsel %vm1334_vm7, %v1324_v25, %v1327_v41  ;;  %v1465_v47 = vadd.s32 %v1464_v35, %v1460_v32  ;;  %vm1335_vm12 = vcmp.lt.s32.totalorder %v3204_v44, 2 }
 0x381   :  { %v1344_v53 = vsel %vm1336_vm8, %v1327_v41, %v1343_v40  ;;  %v1347_v45 = vsel %vm1337_vm9, %v1333_v48, 1326507024  ;;  %v1338_v21 = vsel %vm1334_vm7, %v1318_v33, %v1321_v23  ;;  %v1340_v22 = vsel %vm1336_vm8, %v1324_v25, %v1339_v39 }
 0x382   :  { %v1345_v37 = vsel %vm1335_vm12, %v1342_v57, %v1344_v53  ;;  %v1348_v36 = vsel %vm1336_vm8, %v1330_v31, %v1347_v45  ;;  %v1466_v38 = vadd.s32 536870912, %v1465_v47  ;;  %v1341_v56 = vsel %vm1335_vm12, %v1338_v21, %v1340_v22 }
 0x383   :  { %v1349_v49 = vsel %vm1335_vm12, %v1346_v16, %v1348_v36  ;;  %v3249_v50 = vmul.u32.u64.low %v1350_v30, %v1345_v37  ;;  %v3250_v51 = vmul.u32.u64.high %v1350_v30, %v1345_v37, %v3249_v50  ;;  %v1357_v44 = vmul.u32 %v1350_v30, %v1341_v56 }
 0x384   :  { %v3252_v52 = vmul.u32.u64.low %v1350_v30, %v1349_v49  ;;  %v3253_v54 = vmul.u32.u64.high %v1350_v30, %v1349_v49, %v3252_v52  ;;  %v1467_v55 = vshrl.u32 %v1466_v38, 30  ;;  %v1461_v13 = vadd.s32 %v3231_v10, %v3228_v17 }
 0x385   :  { %v1360_v58 = vadd.s32 1, %v3250_v51  ;;  %v1719_v48 = vmul.f32 0.70710677, %v3189_v8  ;;  %vm1407_vm0 = vcmp.lt.s32.totalorder %v3189_v8, 0  ;;  %vm1406_vm1 = vcmp.le.f32.partialorder %v1405_v12, 0.7853982 }
 0x386   :  { %v1468_v14 = vshll.u32 %v1467_v55, 30  ;;  %vm1359_vm13 = vc.u32 %v3253_v54, %v3249_v50  ;;  %v1358_v43 = vadd.s32 %v3249_v50, %v3253_v54  ;;  %v1491_v10 = vsub.s32 4, %v1467_v55 }
 0x387   :  { %v1361_v61 = vsel %vm1359_vm13, %v1360_v58, %v3250_v51  ;;  %2880 = verf.f32 %v1719_v48  ;;  %v1718_v51 = vmul.f32 0.70710677, %v3191_v11  ;;  %vm1304_vm3 = vcmp.lt.s32.totalorder %v3191_v11, 0 }
 0x388   :  { %v1469_v59 = vsub.s32 %v1465_v47, %v1468_v14  ;;  %v1362_v62 = vadd.s32 %v1361_v61, %v1357_v44  ;;  %v1492_v45 = vsel %vm1407_vm0, %v1491_v10, %v1467_v55  ;;  %vm1303_vm4 = vcmp.le.f32.partialorder %v1302_v18, 0.7853982 }
 0x389   :  { %v1494_v38 = vsel %vm1406_vm1, 0, %v1492_v45  ;;  %v1965_v45 = vld [vmem:[%s3426_s1 + $0xd8] sm:$0xff] }
 0x38a   :  { %v1471_v0 = vsub.s32 0, %v1469_v59  ;;  %v1363_v34 = vadd.s32 536870912, %v1362_v62  ;;  %v1705_v52 = vadd.s32 3, %v1494_v38  ;;  %v1498_v58 = vand.u32 3, %v1494_v38  ;;  %v1887_v38 = vld [vmem:[%s3426_s1 + $0xb8] sm:$0xff] }
 0x38c   :  { %v2509_v1 = vmin.u32 %v1471_v0, %v1469_v59  ;;  %v1364_v3 = vshrl.u32 %v1363_v34, 30  ;;  %v1706_v44 = vand.u32 3, %v1705_v52  ;;  %v1717_v34 = vmul.f32 0.5, %v3189_v8  ;;  %v2040_v52 = vld [vmem:[%s3426_s1 + $0xe0] sm:$0xff] }
 0x38d   :  { %vm1500_vm6 = vcmp.eq.s32.totalorder %v1498_v58, 0  ;;  %vm1503_vm7 = vcmp.eq.s32.totalorder %v1498_v58, 2  ;;  %vm1499_vm12 = vcmp.lt.s32.totalorder %v1498_v58, 2 }
 0x38e   :  { %v1473_v4 = vclz %v2509_v1  ;;  %v1365_v19 = vshll.u32 %v1364_v3, 30  ;;  %v1388_v50 = vsub.s32 4, %v1364_v3  ;;  %vm1711_vm8 = vcmp.eq.s32.totalorder %v1706_v44, 2 }
 0x38f   :  { %vm1708_vm9 = vcmp.eq.s32.totalorder %v1706_v44, 0  ;;  %vm1707_vm13 = vcmp.lt.s32.totalorder %v1706_v44, 2 }
 0x390   :  { %v2510_v63 = vadd.s32 4294967294, %v1473_v4  ;;  %v1366_v6 = vsub.s32 %v1362_v62, %v1365_v19  ;;  %v1389_v55 = vsel %vm1304_vm3, %v1388_v50, %v1364_v3  ;;  %v2119_v50 = vld [vmem:[%s3426_s1 + $0x108] sm:$0xff] }
 0x391   :  { %v2881_v56 = vpop.eup %2880  ;;  %v1391_v61 = vsel %vm1303_vm4, 0, %v1389_v55 }
 0x392   :  { %vm2511_vm14 = vcmp.lt.s32.totalorder %v2510_v63, 0  ;;  %v1368_v9 = vsub.s32 0, %v1366_v6  ;;  %v1723_v1 = vadd.f32 1.0, %v2881_v56  ;;  %v1601_v18 = vadd.s32 3, %v1391_v61  ;;  %v2120_v56 = vld [vmem:[%s3426_s1 + $0x110] sm:$0xff] }
 0x393   :  { %v1476_v7 = vsel %vm2511_vm14, 0, %v2510_v63  ;;  %vm1497_vm14 = vweird.f32 %v3189_v8 }
 0x394   :  { %v1477_v15 = vsub.s32 32, %v1476_v7  ;;  %v1481_v24 = vsub.s32 4294967266, %v1476_v7  ;;  %v2505_v20 = vmin.u32 %v1368_v9, %v1366_v6  ;;  %v1478_v23 = vshll.u32 %v1469_v59, %v1476_v7 }
 0x396   :  { %v1479_v25 = vshrl.u32 %v1461_v13, %v1477_v15  ;;  %v1482_v42 = vadd.s32 127, %v1481_v24  ;;  %v1370_v26 = vclz %v2505_v20  ;;  %v1725_v13 = vmul.f32 %v1723_v1, %v1717_v34  ;;  %v2275_v34 = vld [vmem:[%s3426_s1 + $0x148] sm:$0xff] }
 0x398   :  { %v1480_v27 = vor.u32 %v1479_v25, %v1478_v23  ;;  %v1483_v28 = vshll.u32 %v1482_v42, 23  ;;  %v2506_v29 = vadd.s32 4294967294, %v1370_v26  ;;  %v1395_v23 = vand.u32 3, %v1391_v61  ;;  %v2043_v61 = vld [vmem:[%s3426_s1 + $0xf8] sm:$0xff] }
 0x399   :  { %v1602_v25 = vand.u32 3, %v1601_v18  ;;  %v2197_v18 = vld [vmem:[%s3426_s1 + $0x128] sm:$0xff] }
 0x39a   :  { %v1484_v30 = vor.u32 4788187, %v1483_v28  ;;  %vm2507_vm15 = vcmp.lt.s32.totalorder %v2506_v29, 0  ;;  %v1487_v33 = vcvt.s32.f32 %v1480_v27 }
 0x39b   :  { %v1373_v41 = vsel %vm2507_vm15, 0, %v2506_v29  ;;  %vm1400_vm15 = vcmp.eq.s32.totalorder %v1395_v23, 2 }
 0x39c   :  { %v1485_v32 = vand.u32 2147483647, %v1484_v30  ;;  %v1374_v46 = vsub.s32 32, %v1373_v41  ;;  %v1378_v31 = vsub.s32 4294967266, %v1373_v41  ;;  %v1375_v57 = vshll.u32 %v1366_v6, %v1373_v41 }
 0x39e   :  { %v1488_v17 = vmul.f32 %v1487_v33, %v1485_v32  ;;  %v1376_v35 = vshrl.u32 %v1358_v43, %v1374_v46  ;;  %v1379_v39 = vadd.s32 127, %v1378_v31  ;;  %v1716_v32 = vmul.f32 0.5, %v3191_v11  ;;  %v1962_v43 = vld [vmem:[%s3426_s1 + $0xc0] sm:$0xff]  ;;  %v1963_v46 = vld [vmem:[%s3426_s1 + $0xc8] sm:$0xff] }
 0x3a0   :  { %v1489_v40 = vxor.u32 2147483648, %v1488_v17  ;;  %v1377_v16 = vor.u32 %v1376_v35, %v1375_v57  ;;  %v1380_v47 = vshll.u32 %v1379_v39, 23  ;;  %v1884_v35 = vld [vmem:[%s3426_s1 + $0xa0] sm:$0xff]  ;;  %v1885_v39 = vld [vmem:[%s3426_s1 + $0xa8] sm:$0xff] }
 0x3a2   :  { %v1490_v53 = vsel %vm1407_vm0, %v1489_v40, %v1488_v17  ;;  %v1381_v22 = vor.u32 4788187, %v1380_v47  ;;  %v1384_v36 = vcvt.s32.f32 %v1377_v16  ;;  %vm1607_vm0 = vcmp.eq.s32.totalorder %v1602_v25, 2 }
 0x3a3   :  { %v1493_v21 = vsel %vm1406_vm1, %v3189_v8, %v1490_v53  ;;  %vm1397_vm1 = vcmp.eq.s32.totalorder %v1395_v23, 0  ;;  %v2800_v47 = vpack.c.bf16 %v1963_v46, %v1962_v43 }
 0x3a4   :  { %2882 = vcosq.f32 %v1493_v21  ;;  %v1382_v37 = vand.u32 2147483647, %v1381_v22  ;;  %v2794_v22 = vpack.c.bf16 %v1885_v39, %v1884_v35 }
 0x3a5   :  { %2884 = vsinq.f32 %v1493_v21 }
 0x3a6   :  { %v1385_v49 = vmul.f32 %v1384_v36, %v1382_v37  ;;  %2886 = verf.f32 %v1718_v51  ;;  %v1886_v36 = vld [vmem:[%s3426_s1 + $0xb0] sm:$0xff] }
 0x3a7   :  { %v2797_v51 = vpack.c.bf16 %v1887_v38, %v1886_v36  ;;  %v2529_v38 = vld [vmem:[%s3426_s1 + $0x188] ss:$0 sm:$0xff] }
 0x3a8   :  { %v1386_v54 = vxor.u32 2147483648, %v1385_v49 }
 0x3aa   :  { %v1387_v12 = vsel %vm1304_vm3, %v1386_v54, %v1385_v49  ;;  %vm1604_vm3 = vcmp.eq.s32.totalorder %v1602_v25, 0  ;;  %v2041_v54 = vld [vmem:[%s3426_s1 + $0xe8] sm:$0xff] }
 0x3ab   :  { %v1390_v14 = vsel %vm1303_vm4, %v3191_v11, %v1387_v12  ;;  %vm1396_vm4 = vcmp.lt.s32.totalorder %v1395_v23, 2  ;;  %v2812_v12 = vpack.c.bf16 %v2119_v50, %v2118_v5  ;;  %v2806_v58 = vpack.c.bf16 %v2041_v54, %v2040_v52 }
 0x3ac   :  { %2888 = vcosq.f32 %v1390_v14 }
 0x3ad   :  { %2890 = vsinq.f32 %v1390_v14  ;;  %v2121_v14 = vld [vmem:[%s3426_s1 + $0x118] sm:$0xff] }
 0x3ae   :  { %v2883_v59 = vpop.eup %2882 }
 0x3af   :  { %v2885_v62 = vpop.eup %2884  ;;  %v1504_v0 = vxor.u32 2147483648, %v2883_v59 }
 0x3b0   :  { %v1501_v4 = vxor.u32 2147483648, %v2885_v62  ;;  %v2887_v20 = vpop.eup %2886 }
 0x3b1   :  { %v1505_v3 = vsel %vm1503_vm7, %v1504_v0, %v2885_v62  ;;  %v1713_v19 = vsel %vm1711_vm8, %v1504_v0, %v2885_v62  ;;  %v1722_v30 = vadd.f32 1.0, %v2887_v20  ;;  %vm1394_vm7 = vweird.f32 %v3191_v11  ;;  %v1964_v11 = vld [vmem:[%s3426_s1 + $0xd0] sm:$0xff]  ;;  %v2274_v0 = vld [vmem:[%s3426_s1 + $0x140] sm:$0xff] }
 0x3b2   :  { %v1502_v63 = vsel %vm1500_vm6, %v2883_v59, %v1501_v4  ;;  %v1710_v6 = vsel %vm1708_vm9, %v2883_v59, %v1501_v4  ;;  %vm1603_vm6 = vcmp.lt.s32.totalorder %v1602_v25, 2  ;;  %v2803_v49 = vpack.c.bf16 %v1965_v45, %v1964_v11  ;;  %v2042_v59 = vld [vmem:[%s3426_s1 + $0xf0] sm:$0xff]  ;;  %v2196_v4 = vld [vmem:[%s3426_s1 + $0x120] sm:$0xff]  ;;  %v2359_v25 = vld [vmem:[%s3426_s1 + $0x168] sm:$0xff] }
 0x3b3   :  { %v1506_v7 = vsel %vm1499_vm12, %v1502_v63, %v1505_v3  ;;  %v1714_v9 = vsel %vm1707_vm13, %v1710_v6, %v1713_v19  ;;  %v1724_v57 = vmul.f32 %v1722_v30, %v1716_v32  ;;  %v2815_v62 = vpack.c.bf16 %v2121_v14, %v2120_v56  ;;  %v2276_v63 = vld [vmem:[%s3426_s1 + $0x150] sm:$0xff]  ;;  %v2277_v6 = vld [vmem:[%s3426_s1 + $0x158] sm:$0xff] }
 0x3b4   :  { %v1507_v15 = vsel %vm1497_vm14, nan, %v1506_v7  ;;  %v1715_v24 = vsel %vm1497_vm14, nan, %v1714_v9  ;;  %v2809_v1 = vpack.c.bf16 %v2043_v61, %v2042_v59  ;;  %v2824_v3 = vpack.c.bf16 %v2275_v34, %v2274_v0  ;;  %v2198_v9 = vld [vmem:[%s3426_s1 + $0x130] sm:$0xff] }
 0x3b5   :  { %v1727_v42 = vsel %vm989_vm11, %v1715_v24, %v1725_v13  ;;  %v2818_v7 = vpack.c.bf16 %v2197_v18, %v2196_v4  ;;  %v2199_v13 = vld [vmem:[%s3426_s1 + $0x138] sm:$0xff] }
 0x3b6   :  { %v3276_v26 = vsel %vm782_vm10, %v1507_v15, %v1727_v42  ;;  %v2889_v27 = vpop.eup %2888  ;;  %v2827_v15 = vpack.c.bf16 %v2277_v6, %v2276_v63  ;;  %v2821_v24 = vpack.c.bf16 %v2199_v13, %v2198_v9  ;;  %v2360_v42 = vld [vmem:[%s3426_s1 + $0x170] sm:$0xff] }
 0x3b7   :  { %v2891_v28 = vpop.eup %2890  ;;  %v1401_v29 = vxor.u32 2147483648, %v2889_v27  ;;  %v2122_v19 = vrot.slane %v3276_v26, 2  ;;  %v2278_v20 = vrot.slane %v3276_v26, 6  ;;  %v2200_v23 = vrot.slane %v3276_v26, 4 }
 0x3b8   :  { %v1398_v8 = vxor.u32 2147483648, %v2891_v28 }
 0x3b9   :  { %v1402_v33 = vsel %vm1400_vm15, %v1401_v29, %v2891_v28  ;;  %v1609_v41 = vsel %vm1607_vm0, %v1401_v29, %v2891_v28  ;;  %v2362_v28 = vld [vmem:[%s3426_s1 + $0x180] sm:$0xff] }
 0x3ba   :  { %v1399_v31 = vsel %vm1397_vm1, %v2889_v27, %v1398_v8  ;;  %v1606_v17 = vsel %vm1604_vm3, %v2889_v27, %v1398_v8  ;;  %v2361_v27 = vld [vmem:[%s3426_s1 + $0x178] sm:$0xff] }
 0x3bb   :  { %v1403_v10 = vsel %vm1396_vm4, %v1399_v31, %v1402_v33  ;;  %v1610_v48 = vsel %vm1603_vm6, %v1606_v17, %v1609_v41  ;;  %v2833_v29 = vpack.c.bf16 %v2362_v28, %v2361_v27 }
 0x3bc   :  { %v1404_v40 = vsel %vm1394_vm7, nan, %v1403_v10  ;;  %v1611_v16 = vsel %vm1394_vm7, nan, %v1610_v48 }
 0x3bd   :  { %v1726_v53 = vsel %vm989_vm11, %v1611_v16, %v1724_v57 }
 0x3be   :  { %v1728_v21 = vsel %vm782_vm10, %v1404_v40, %v1726_v53 }
 0x3bf   :  { %v1739_v37 = vrot.slane %v1728_v21, 2  ;;  %2686 = vmatmul.mubr.msk.f32.vlgmr.msra.gmra.mrb[12].mxu1 %vm700_vm5, %v1728_v21  ;;  %v1966_v55 = vrot.slane %v1728_v21, 6  ;;  %v1888_v44 = vrot.slane %v1728_v21, 4  ;;  %v2528_v21 = vld [vmem:[%s3426_s1 + $0x160] ss:$0 sm:$0xff] }
 0x3c0   :  { %2801 = vmatpush3.bf16.msra.mxu1 %v2800_v47  ;;  %2707 = vmatprep.mubr.msk.f32.mxu1 %vm2919_vm2, %v2918_v2 }
 0x3c1   :  { %2675 = vmatmul.mubr.msk.f32.vlgmr.msra.gmra.mrb[8].mxu0 %vm700_vm5, %v1739_v37  ;;  %2802 = vmatprep.subr.bf16.mxu1 %v2931_v60 }
 0x3c2   :  { %2795 = vmatpush3.bf16.msra.mxu0 %v2794_v22  ;;  %2696 = vmatprep.mubr.msk.f32.mxu0 %vm2919_vm2, %v2918_v2 }
 0x3c3   :  { %2796 = vmatprep.subr.bf16.mxu0 %v2931_v60 }
 0x3c4   :  { %2804 = vmatpush3.bf16.msra.mxu1 %v2803_v49 }
 0x3c5   :  { %2811 = vmatprep.subr.bf16.mxu1 %v2931_v60 }
 0x3c6   :  { %2798 = vmatpush3.bf16.msra.mxu0 %v2797_v51 }
 0x3c7   :  { %2708 = vmatmul.mubr.msk.f32.vlgmr.msra.gmra.mrb[14].mxu1 %vm700_vm5, %v1966_v55  ;;  %2805 = vmatprep.subr.bf16.mxu0 %v2931_v60 }
 0x3c8   :  { %2813 = vmatpush3.bf16.msra.mxu1 %v2812_v12  ;;  %2729 = vmatprep.mubr.msk.f32.mxu1 %vm2919_vm2, %v2918_v2 }
 0x3c9   :  { %2697 = vmatmul.mubr.msk.f32.vlgmr.msra.gmra.mrb[10].mxu0 %vm700_vm5, %v1888_v44  ;;  %2814 = vmatprep.subr.bf16.mxu1 %v2931_v60 }
 0x3ca   :  { %2807 = vmatpush3.bf16.msra.mxu0 %v2806_v58  ;;  %2718 = vmatprep.mubr.msk.f32.mxu0 %vm2919_vm2, %v2918_v2 }
 0x3cb   :  { %2808 = vmatprep.subr.bf16.mxu0 %v2931_v60 }
 0x3cc   :  { %2816 = vmatpush3.bf16.msra.mxu1 %v2815_v62 }
 0x3cd   :  { %2823 = vmatprep.subr.bf16.mxu1 %v2931_v60 }
 0x3ce   :  { %2810 = vmatpush3.bf16.msra.mxu0 %v2809_v1 }
 0x3cf   :  { %2730 = vmatmul.mubr.msk.f32.vlgmr.msra.gmra.mrb[16].mxu1 %vm700_vm5, %v2122_v19  ;;  %2817 = vmatprep.subr.bf16.mxu0 %v2931_v60 }
 0x3d0   :  { %2825 = vmatpush3.bf16.msra.mxu1 %v2824_v3  ;;  %2751 = vmatprep.mubr.msk.f32.mxu1 %vm2919_vm2, %v2918_v2 }
 0x3d1   :  { %2719 = vmatmul.mubr.msk.f32.vlgmr.msra.gmra.mrb[12].mxu0 %vm700_vm5, %v3276_v26  ;;  %2826 = vmatprep.subr.bf16.mxu1 %v2931_v60  ;;  %v2830_v26 = vpack.c.bf16 %v2360_v42, %v2359_v25 }
 0x3d2   :  { %2819 = vmatpush3.bf16.msra.mxu0 %v2818_v7  ;;  %2740 = vmatprep.mubr.msk.f32.mxu0 %vm2919_vm2, %v2918_v2 }
 0x3d3   :  { %2820 = vmatprep.subr.bf16.mxu0 %v2931_v60 }
 0x3d4   :  { %2828 = vmatpush3.bf16.msra.mxu1 %v2827_v15 }
 0x3d6   :  { %2822 = vmatpush3.bf16.msra.mxu0 %v2821_v24 }
 0x3d7   :  { %2752 = vmatmul.mubr.msk.f32.vlgmr.msra.gmra.mrb[18].mxu1 %vm700_vm5, %v2278_v20  ;;  %2829 = vmatprep.subr.bf16.mxu0 %v2931_v60 }
 0x3d9   :  { %2741 = vmatmul.mubr.msk.f32.vlgmr.msra.gmra.mrb[14].mxu0 %vm700_vm5, %v2200_v23 }
 0x3da   :  { %2762 = vmatprep.mubr.msk.f32.mxu0 %vm2919_vm2, %v2918_v2  ;;  %2831 = vmatpush3.bf16.msra.mxu0 %v2830_v26  ;;  %vm2441_vm2 = vcmask 58368  }
 0x3db   :  { %2832 = vmatprep.subr.bf16.mxu0 %v2931_v60 }
 0x3de   :  { %2834 = vmatpush3.bf16.msra.mxu0 %v2833_v29 }
 0x492   :  { %v1880_v2 = vpop.f32.mrb[12].mxu1 }
 0x493   :  { %v2687_v30 = vpop.f32.mrb[13].mxu1 }
 0x494   :  { %v1808_v8 = vpop.f32.mrb[8].mxu0 }
 0x495   :  { %v1881_v32 = vadd.f32 %v1880_v2, %v1808_v8  ;;  %v2676_v33 = vpop.f32.mrb[9].mxu0 }
 0x49a   :  { %v2035_v41 = vpop.f32.mrb[14].mxu1 }
 0x49b   :  { %v2709_v43 = vpop.f32.mrb[15].mxu1 }
 0x49c   :  { %v1957_v46 = vpop.f32.mrb[10].mxu0 }
 0x49d   :  { %v1961_v31 = vadd.f32 %v1957_v46, %v1881_v32  ;;  %v2698_v17 = vpop.f32.mrb[11].mxu0 }
 0x49f   :  { %v2039_v10 = vadd.f32 %v2035_v41, %v1961_v31 }
 0x4a2   :  { %v2191_v48 = vpop.f32.mrb[16].mxu1 }
 0x4a3   :  { %v2731_v57 = vpop.f32.mrb[17].mxu1 }
 0x4a4   :  { %v2113_v35 = vpop.f32.mrb[12].mxu0 }
 0x4a5   :  { %v2117_v39 = vadd.f32 %v2113_v35, %v2039_v10  ;;  %v2720_v40 = vpop.f32.mrb[13].mxu0 }
 0x4a7   :  { %v2195_v16 = vadd.f32 %v2191_v48, %v2117_v39 }
 0x4aa   :  { %v2347_v47 = vpop.f32.mrb[18].mxu1 }
 0x4ab   :  { %v2753_v60 = vpop.f32.mrb[19].mxu1 }
 0x4ac   :  { %v2269_v53 = vpop.f32.mrb[14].mxu0 }
 0x4ad   :  { %v2273_v11 = vadd.f32 %v2269_v53, %v2195_v16  ;;  %v2742_v45 = vpop.f32.mrb[15].mxu0 }
 0x4af   :  { %v2351_v22 = vadd.f32 %v2347_v47, %v2273_v11 }
 0x4b1   :  { %v2357_v37 = vadd.f32 %v2528_v21, %v2351_v22 }
 0x4b3   :  { %v2358_v36 = vmax.f32 %v2357_v37, 0.0 }
 0x4b5   :  { %2763 = vmatmul.mubr.msk.f32.vlgmr.msra.gmra.mrb[16].mxu0 %vm700_vm5, %v2358_v36 }
 0x588   :  { %v2437_v49 = vpop.f32.mrb[16].mxu0 }
 0x589   :  { %v2438_v5 = vadd.f32 %v2529_v38, %v2437_v49  ;;  %v2764_v50 = vpop.f32.mrb[17].mxu0 }
 0x58b   :  { %2442 = vst.msk [vmem:[#allocation2] sm:$0x3] %vm2441_vm2, %v2438_v5 }
 0x58c   :  { %2903 = shalt.err (!%p2900_p4)
}
 0x58d   :  { %s2904_s22 = scalar_lea.hbm %s3427_s2, 32 }
 0x58e   :  { %p2905_p5 = scmp.ne.s32.totalorder %s3427_s2, %s2904_s22  ;;  %p2908_p6 = scmp.lt.u32.totalorder %s2904_s22, %s3427_s2 }
 0x590   :  { %p2910_p7 = pnand %p2908_p6, %p2905_p5 }
 0x592   :  { %2913 = shalt.err (!%p2910_p7)
}
 0x593   :  { %2452 = dma.vmem_to_hbm [thread:$0]  %s2450_s18, 32, %s3427_s2, [#allocation3]  }
 0x594   :  { %2914 = dma.done.wait [#allocation3], 32  }
 0x595   :  { %2915 = vsyncadd [#allocation3], 4294967264 }
 0x596   :  { %2456 = vsyncpa [#allocation3], 1 }

</bundles_post_ra>
